<compile_context>
chip_gen: v6e
topology: v6e:2x2x1
jax: 0.10.0
libtpu: 0.0.40
codegen_flags: <defaults>
</compile_context>

<pallas_src>
import functools

import jax
import jax.numpy as jnp
from jax.experimental import pallas as pl
from jax.experimental.pallas import tpu as pltpu


_RESIDENT_WEIGHT_BUDGET = 20 << 20   # bytes of bf16 weights kept VMEM-resident
_VMEM_CAP = 48 << 20                 # stay well under v7x's 64 MiB / TC


def _round_up(x, m):
    return ((x + m - 1) // m) * m


def _pick_batch_tile(batch):
    """256-512 row tiles; ensure >=2 grid steps when the batch allows (v7x megacore)."""
    half = pl.cdiv(max(batch, 1), 2)
    return max(16, min(512, _round_up(half, 16)))


def _pick_k_tile(k_dim, max_tk=512):
    """Largest multiple-of-128 divisor of K up to max_tk (else K whole)."""
    if k_dim <= max_tk:
        return k_dim
    for tk in range(max_tk, 127, -128):
        if k_dim % tk == 0:
            return tk
    # TODO(synk): no clean multiple-of-128 divisor -> keep K whole (correct,
    # may be VMEM-heavy for pathological K); pad K upstream if ever needed.
    return k_dim


def _clamp_vmem(nbytes):
    return min(max(int(nbytes * 1.5) + (4 << 20), 16 << 20), _VMEM_CAP)


# ----------------------------------------------------------------------------
# Fused kernel: both layers, weights VMEM-resident, batch streamed
# ----------------------------------------------------------------------------
def _fused_kernel(x_ref, w1_ref, b1_ref, w2_ref, b2_ref, o_ref):
    # Cast the streamed x tile to bf16 in-kernel (avoids a separate HBM pass).
    x = x_ref[...].astype(jnp.bfloat16)
    h = jnp.dot(x, w1_ref[...], preferred_element_type=jnp.float32)
    h = jnp.maximum(h + b1_ref[...], 0.0)                      # f32 epilogue (VPU)
    y = jnp.dot(h.astype(jnp.bfloat16), w2_ref[...],
                preferred_element_type=jnp.float32)
    o_ref[...] = (y + b2_ref[...]).astype(o_ref.dtype)         # bf16 store


def _forward_fused(x_flat, w1, b1, w2, b2, out_dtype):
    B, Din = x_flat.shape
    Hid = w1.shape[1]
    Dout = w2.shape[1]

    tb = _pick_batch_tile(B)
    nb = pl.cdiv(B, tb)

    x_it = x_flat.dtype.itemsize
    o_it = jnp.dtype(out_dtype).itemsize

    # Streamed x/out tiles double-buffered; resident weights/biases counted once.
    vmem = (2 * (tb * Din * x_it + tb * Dout * o_it)
            + Din * Hid * w1.dtype.itemsize + Hid * Dout * w2.dtype.itemsize
            + 8 * max(Hid, 128) * 4 + 8 * max(Dout, 128) * 4
            + tb * Hid * 4 + tb * Dout * 4)                    # f32 intermediates

    cost = pl.CostEstimate(
        flops=2 * B * (Din * Hid + Hid * Dout),
        transcendentals=0,
        bytes_accessed=(B * Din * x_it
                        + w1.size * w1.dtype.itemsize + w2.size * w2.dtype.itemsize
                        + b1.size * b1.dtype.itemsize + b2.size * b2.dtype.itemsize
                        + B * Dout * o_it),
    )

    # Constant index_map -> weights never change across the grid: single-buffer.
    resident = functools.partial(pl.BlockSpec, pipeline_mode=pl.Buffered(1))

    return pl.pallas_call(
        _fused_kernel,
        out_shape=jax.ShapeDtypeStruct((B, Dout), out_dtype),
        grid=(nb,),
        in_specs=[
            pl.BlockSpec((tb, Din), lambda i: (i, 0)),     # x tile: streamed, dbl-buffered
            resident((Din, Hid), lambda i: (0, 0)),        # W1: VMEM-resident
            resident((1, Hid), lambda i: (0, 0)),          # b1
            resident((Hid, Dout), lambda i: (0, 0)),       # W2: VMEM-resident
            resident((1, Dout), lambda i: (0, 0)),         # b2
        ],
        out_specs=pl.BlockSpec((tb, Dout), lambda i: (i, 0)),
        compiler_params=pltpu.CompilerParams(
            dimension_semantics=("parallel",),             # megacore on v7x
            vmem_limit_bytes=_clamp_vmem(vmem),
        ),
        cost_estimate=cost,
    )(x_flat, w1, b1, w2, b2)


# ----------------------------------------------------------------------------
# Fallback: K-tiled single-layer matmul (for weights too big to co-reside)
# ----------------------------------------------------------------------------
def _linear_kernel(x_ref, w_ref, b_ref, o_ref, acc_ref, *, relu):
    k = pl.program_id(1)

    @pl.when(k == 0)
    def _():
        acc_ref[...] = jnp.zeros_like(acc_ref)

    x = x_ref[...].astype(jnp.bfloat16)
    acc_ref[...] += jnp.dot(x, w_ref[...], preferred_element_type=jnp.float32)

    @pl.when(k == pl.num_programs(1) - 1)
    def _():
        y = acc_ref[...] + b_ref[...]
        if relu:
            y = jnp.maximum(y, 0.0)
        o_ref[...] = y.astype(o_ref.dtype)


def _linear(x, w, b, *, relu, out_dtype, tb):
    B, K = x.shape
    N = w.shape[1]
    tk = _pick_k_tile(K)
    nk = K // tk                       # tk divides K (or equals it) by construction
    nb = pl.cdiv(B, tb)

    x_it = x.dtype.itemsize
    o_it = jnp.dtype(out_dtype).itemsize
    vmem = (2 * (tb * tk * x_it + tk * N * w.dtype.itemsize + tb * N * o_it)
            + 8 * max(N, 128) * 4 + tb * N * 4)

    cost = pl.CostEstimate(
        flops=2 * B * K * N,
        transcendentals=0,
        bytes_accessed=(B * K * x_it + w.size * w.dtype.itemsize
                        + b.size * b.dtype.itemsize + B * N * o_it),
    )

    return pl.pallas_call(
        functools.partial(_linear_kernel, relu=relu),
        out_shape=jax.ShapeDtypeStruct((B, N), out_dtype),
        grid=(nb, nk),                                     # reduction axis last
        in_specs=[
            pl.BlockSpec((tb, tk), lambda i, k: (i, k)),   # x: streamed over batch & K
            pl.BlockSpec((tk, N), lambda i, k: (k, 0)),    # W: streamed over K
            pl.BlockSpec((1, N), lambda i, k: (0, 0),
                         pipeline_mode=pl.Buffered(1)),    # bias: resident
        ],
        out_specs=pl.BlockSpec((tb, N), lambda i, k: (i, 0)),
        scratch_shapes=[pltpu.VMEM((tb, N), jnp.float32)], # f32 accumulator
        compiler_params=pltpu.CompilerParams(
            dimension_semantics=("parallel", "arbitrary"),
            vmem_limit_bytes=_clamp_vmem(vmem),
        ),
        cost_estimate=cost,
    )(x, w, b)


def _forward_split(x_flat, w1, b1, w2, b2, out_dtype):
    tb = _pick_batch_tile(x_flat.shape[0])
    h = _linear(x_flat, w1, b1, relu=True, out_dtype=jnp.bfloat16, tb=tb)
    return _linear(h, w2, b2, relu=False, out_dtype=out_dtype, tb=tb)


# ----------------------------------------------------------------------------
# Frozen base-model forward (dispatches fused vs. K-tiled fallback)
# ----------------------------------------------------------------------------
def base_model_forward(x_flat, w1, b1, w2, b2, *, out_dtype=jnp.bfloat16,
                       force_split=False):
    """Frozen base-model forward on [B, Din] features (Pallas hot path)."""
    Din, Hid = w1.shape
    Dout = w2.shape[1]
    resident_bytes = (Din * Hid * w1.dtype.itemsize
                      + Hid * Dout * w2.dtype.itemsize)
    if force_split or resident_bytes > _RESIDENT_WEIGHT_BUDGET:
        # Weights too large to co-reside in VMEM (hit first on v7x, 64 MiB/TC):
        # two streamed calls, each K-tiled with an f32 accumulator.
        return _forward_split(x_flat, w1, b1, w2, b2, out_dtype)
    return _forward_fused(x_flat, w1, b1, w2, b2, out_dtype)


# ----------------------------------------------------------------------------
# ResidEstimator wrapper (JAX side)
# ----------------------------------------------------------------------------
class ResidEstimator:
    """JAX/Pallas port of models.base_nonrnn.ResidEstimator.

    Holds a frozen (non-trainable) base model; forward() is abstract, exactly
    as in the PyTorch source.
    """

    def __init__(self, base_model_params):
        # Frozen base-model parameters (stand-in for torch.load(path).eval()).
        self.base_model = base_model_params
        self.path = None

    def base_forward(self, x_nchw, out_dtype=jnp.bfloat16):
        """Frozen base-model forward on NCHW input (Pallas hot path).

        Output is bf16 by default (f32 accumulation in-kernel); pass
        out_dtype=jnp.float32 if the downstream residual head needs f32.
        """
        B = x_nchw.shape[0]
        x_flat = x_nchw.reshape(B, -1)   # glue: NCHW -> [B, C*H*W] (fuses, no copy pass)
        # Freeze at use time so gradients never flow through the base model,
        # even when called inside jit/grad.
        w1, b1, w2, b2 = jax.tree_util.tree_map(
            jax.lax.stop_gradient, self.base_model)
        return base_model_forward(x_flat, w1, b1, w2, b2, out_dtype=out_dtype)

    def forward(self, x, state=None, use_horizon=True):
        # Exact semantics of the PyTorch module: abstract method.
        raise NotImplementedError()

    # TODO(synk): fit()/fit_resid() are a training loop (optimizer, epochs,
    # dataloaders) with no Pallas-kernel equivalent; not translated.


# ----------------------------------------------------------------------------
# Deterministic parameter construction (synthetic frozen base model)
# ----------------------------------------------------------------------------
def make_base_model_params(key, d_in, d_hidden, d_out):
    k1, k2 = jax.random.split(key)
    # Frozen weights stored in bf16 (halves weight HBM traffic, bf16 MXU);
    # biases kept in f32 for the f32 epilogue.
    w1 = (jax.random.normal(k1, (d_in, d_hidden), jnp.float32)
          / jnp.sqrt(d_in)).astype(jnp.bfloat16)
    b1 = jnp.zeros((1, d_hidden), jnp.float32)
    w2 = (jax.random.normal(k2, (d_hidden, d_out), jnp.float32)
          / jnp.sqrt(d_hidden)).astype(jnp.bfloat16)
    b2 = jnp.zeros((1, d_out), jnp.float32)
    return (w1, b1, w2, b2)


if __name__ == "__main__":
    key = jax.random.PRNGKey(0)
    kx, kp = jax.random.split(key)

    # Small NCHW input consistent with an image-like state: [B, C, H, W]
    B, C, H, W = 2, 4, 16, 16
    x = jax.random.normal(kx, (B, C, H, W), jnp.float32)

    d_in = C * H * W          # 1024
    d_hidden = 256            # full 256-wide MXU tile on v6e/v7x
    d_out = d_in              # base model predicts a same-shaped flat state

    params = make_base_model_params(kp, d_in, d_hidden, d_out)
    est = ResidEstimator(params)

    y = est.base_forward(x)
    jax.block_until_ready(y)
    assert y.shape == (B, d_out)
    assert y.dtype == jnp.bfloat16

    # Plain-JAX reference using the same bf16 operands / f32 accumulation.
    w1, b1, w2, b2 = params
    x_flat = x.reshape(B, -1)
    h_ref = jnp.maximum(
        jnp.dot(x_flat.astype(jnp.bfloat16), w1,
                preferred_element_type=jnp.float32) + b1, 0.0)
    y_ref = jnp.dot(h_ref.astype(jnp.bfloat16), w2,
                    preferred_element_type=jnp.float32) + b2
    assert jnp.allclose(y.astype(jnp.float32), y_ref, atol=3e-2, rtol=3e-2)

    # Exercise the K-tiled fallback path (used automatically when resident
    # weights exceed the VMEM budget, e.g. large models on v7x).
    y_split = base_model_forward(x_flat, *params, force_split=True)
    jax.block_until_ready(y_split)
    assert y_split.shape == (B, d_out)
    assert jnp.allclose(y_split.astype(jnp.float32), y_ref, atol=3e-2, rtol=3e-2)

    # forward() must remain abstract, as in the PyTorch module.
    try:
        est.forward(x)
        raise RuntimeError("forward() should have raised NotImplementedError")
    except NotImplementedError:
        pass

    print("KERNEL_OK")
</pallas_src>

<mosaic_0001>
module attributes {stable_mosaic.version = 11 : i64} {
  func.func @_fused_kernel(%arg0: i32, %arg1: memref<16x1024xf32, #tpu.memory_space<vmem>>, %arg2: memref<1024x256xbf16, #tpu.memory_space<vmem>>, %arg3: memref<1x256xf32, #tpu.memory_space<vmem>>, %arg4: memref<256x1024xbf16, #tpu.memory_space<vmem>>, %arg5: memref<1x1024xf32, #tpu.memory_space<vmem>>, %arg6: memref<16x1024xbf16, #tpu.memory_space<vmem>>) attributes {dimension_semantics = [#tpu.dimension_semantics<parallel>], iteration_bounds = array<i64: 1>, scalar_prefetch = 0 : i64, scratch_operands = 0 : i64, tpu.core_type = #tpu.core_type<tc>, window_params = [{transform_indices = @transform_0, window_bounds = array<i64: 16, 1024>}, {pipeline_mode = #tpu.pipeline_mode<synchronous>, transform_indices = @transform_1, window_bounds = array<i64: 1024, 256>}, {pipeline_mode = #tpu.pipeline_mode<synchronous>, transform_indices = @transform_2, window_bounds = array<i64: 1, 256>}, {pipeline_mode = #tpu.pipeline_mode<synchronous>, transform_indices = @transform_3, window_bounds = array<i64: 256, 1024>}, {pipeline_mode = #tpu.pipeline_mode<synchronous>, transform_indices = @transform_4, window_bounds = array<i64: 1, 1024>}, {transform_indices = @transform_5, window_bounds = array<i64: 16, 1024>}]} {
    %c0 = arith.constant 0 : index
    %c0_0 = arith.constant 0 : index
    %0 = vector.load %arg1[%c0, %c0_0] : memref<16x1024xf32, #tpu.memory_space<vmem>>, vector<16x1024xf32>
    %1 = arith.truncf %0 : vector<16x1024xf32> to vector<16x1024xbf16>
    %c0_1 = arith.constant 0 : index
    %c0_2 = arith.constant 0 : index
    %2 = vector.load %arg2[%c0_1, %c0_2] : memref<1024x256xbf16, #tpu.memory_space<vmem>>, vector<1024x256xbf16>
    %cst = arith.constant dense<0.000000e+00> : vector<16x256xf32>
    %3 = tpu.matmul %1, %2, %cst {dimension_numbers = #tpu.dot_dimension_numbers<[1], [0], [0], [1], [0, 0, 1, 1], [], []>} : vector<16x1024xbf16>, vector<1024x256xbf16>, vector<16x256xf32> -> vector<16x256xf32>
    %c0_3 = arith.constant 0 : index
    %c0_4 = arith.constant 0 : index
    %4 = vector.load %arg3[%c0_3, %c0_4] : memref<1x256xf32, #tpu.memory_space<vmem>>, vector<1x256xf32>
    %5 = vector.broadcast %4 : vector<1x256xf32> to vector<16x256xf32>
    %6 = arith.addf %3, %5 : vector<16x256xf32>
    %cst_5 = arith.constant 0.000000e+00 : f32
    %7 = vector.broadcast %cst_5 : f32 to vector<16x256xf32>
    %8 = arith.maximumf %6, %7 : vector<16x256xf32>
    %9 = arith.truncf %8 : vector<16x256xf32> to vector<16x256xbf16>
    %c0_6 = arith.constant 0 : index
    %c0_7 = arith.constant 0 : index
    %10 = vector.load %arg4[%c0_6, %c0_7] : memref<256x1024xbf16, #tpu.memory_space<vmem>>, vector<256x1024xbf16>
    %cst_8 = arith.constant dense<0.000000e+00> : vector<16x1024xf32>
    %11 = tpu.matmul %9, %10, %cst_8 {dimension_numbers = #tpu.dot_dimension_numbers<[1], [0], [0], [1], [0, 0, 1, 1], [], []>} : vector<16x256xbf16>, vector<256x1024xbf16>, vector<16x1024xf32> -> vector<16x1024xf32>
    %c0_9 = arith.constant 0 : index
    %c0_10 = arith.constant 0 : index
    %12 = vector.load %arg5[%c0_9, %c0_10] : memref<1x1024xf32, #tpu.memory_space<vmem>>, vector<1x1024xf32>
    %13 = vector.broadcast %12 : vector<1x1024xf32> to vector<16x1024xf32>
    %14 = arith.addf %11, %13 : vector<16x1024xf32>
    %15 = arith.truncf %14 : vector<16x1024xf32> to vector<16x1024xbf16>
    %c0_11 = arith.constant 0 : index
    %c0_12 = arith.constant 0 : index
    %16 = vector.load %arg6[%c0_11, %c0_12] : memref<16x1024xbf16, #tpu.memory_space<vmem>>, vector<16x1024xbf16>
    tpu.vector_store %arg6[%c0_11, %c0_12], %15 {strides = array<i32>} : memref<16x1024xbf16, #tpu.memory_space<vmem>>, vector<16x1024xbf16>,
    return
  }
  func.func @transform_0(%arg0: i32) -> (i32, i32) {
    %c0_i32 = arith.constant 0 : i32
    %c0_i32_0 = arith.constant 0 : i32
    return %arg0, %c0_i32 : i32, i32
  }
  func.func @transform_1(%arg0: i32) -> (i32, i32) {
    %c0_i32 = arith.constant 0 : i32
    %c0_i32_0 = arith.constant 0 : i32
    %c0_i32_1 = arith.constant 0 : i32
    return %c0_i32, %c0_i32_0 : i32, i32
  }
  func.func @transform_2(%arg0: i32) -> (i32, i32) {
    %c0_i32 = arith.constant 0 : i32
    %c0_i32_0 = arith.constant 0 : i32
    %c0_i32_1 = arith.constant 0 : i32
    return %c0_i32, %c0_i32_0 : i32, i32
  }
  func.func @transform_3(%arg0: i32) -> (i32, i32) {
    %c0_i32 = arith.constant 0 : i32
    %c0_i32_0 = arith.constant 0 : i32
    %c0_i32_1 = arith.constant 0 : i32
    return %c0_i32, %c0_i32_0 : i32, i32
  }
  func.func @transform_4(%arg0: i32) -> (i32, i32) {
    %c0_i32 = arith.constant 0 : i32
    %c0_i32_0 = arith.constant 0 : i32
    %c0_i32_1 = arith.constant 0 : i32
    return %c0_i32, %c0_i32_0 : i32, i32
  }
  func.func @transform_5(%arg0: i32) -> (i32, i32) {
    %c0_i32 = arith.constant 0 : i32
    %c0_i32_0 = arith.constant 0 : i32
    return %arg0, %c0_i32 : i32, i32
  }
}

</mosaic_0001>

<bundles_post_ra>
// kernel: tpu_custom_call.1
= control target key start
LH: loop header
LB: loop body
LE: loop exit
PB: predicated region body
PF: predicated region fallthrough
CT: control target
= control target key end

     0   :  { %10 = vsyncpa [#allocation3], 0  ;;  %s3179_s0 = inlined_call_operand.hbm [shape: f32[2,1024], index: 0, kind: input, shape index: {}]   ;;  %s3180_s1 = inlined_call_operand.hbm [shape: bf16[1024,256], index: 1, kind: input, shape index: {}]   ;;  %s3181_s2 = inlined_call_operand.vmem [shape: f32[1,256], index: 2, kind: input, shape index: {}]   ;;  %s3182_s3 = inlined_call_operand.hbm [shape: bf16[256,1024], index: 3, kind: input, shape index: {}]   ;;  %s3183_s4 = inlined_call_operand.hbm [shape: f32[1,1024], index: 4, kind: input, shape index: {}]   ;;  %s3184_s5 = inlined_call_operand.hbm [shape: bf16[2,1024], index: 5, kind: output, shape index: {}]  }
   0x1   :  { %11 = vsyncpa [#allocation6], 0 }
   0x2   :  { %12 = vsyncpa [#allocation9], 0 }
   0x3   :  { %13 = vsyncpa [#allocation4], 0 }
   0x4   :  { %18 = vsyncadd [#allocation3], 1792  ;;  %s3002_s18 = smov [#allocation5]  }
   0x5   :  { %s31_s19 = sshll.u32 %s3002_s18, 4  ;;  %s32_s19 = int_to_ptr.vmem [resolvable:$true] %s31_s19 }
   0x6   :  { %s2902_s20 = scalar_lea.vmem %s32_s19, 16384  ;;  %p2907_p1 = scmp.lt.s32.totalorder %s32_s19, %s32_s19 }
   0x7   :  { %p2903_p0 = scmp.ne.s32.totalorder %s32_s19, %s2902_s20  ;;  %p2908_p2 = scmp.lt.s32.totalorder %s2902_s20, %s2902_s20 }
   0x9   :  { %p2909_p3 = por %p2908_p2, %p2907_p1 }
   0xb   :  { %p2910_p4 = pnand %p2909_p3, %p2903_p0 }
   0xd   :  { %2913 = shalt.err (!%p2910_p4)
}
   0xe   :  { %s3003_s21 = smov 128   ;;  %s3004_s22 = smov 8  }
   0xf   :  { %37 = dma.hbm_to_vmem [thread:$0]  %s3180_s1, 16384, %s32_s19, [#allocation6], %s3003_s21, %s3003_s21, %s3004_s22  }
  0x10   :  { %s3005_s25 = smov [#allocation2]  }
  0x11   :  { %s19_s26 = sshll.u32 %s3005_s25, 4  ;;  %s20_s26 = int_to_ptr.vmem [resolvable:$true] %s19_s26 }
  0x12   :  { %s2922_s27 = scalar_lea.vmem %s20_s26, 256  ;;  %s2926_s28 = scalar_lea.vmem %s20_s26, 2048 }
  0x13   :  { %p2923_p5 = scmp.ne.s32.totalorder %s20_s26, %s2922_s27  ;;  %p2927_p6 = scmp.lt.s32.totalorder %s20_s26, %s20_s26 }
  0x14   :  { %p2928_p7 = scmp.lt.s32.totalorder %s2926_s28, %s2922_s27 }
  0x16   :  { %p2929_p8 = por %p2928_p7, %p2927_p6 }
  0x18   :  { %p2930_p9 = pnand %p2929_p8, %p2923_p5 }
  0x1a   :  { %2933 = shalt.err (!%p2930_p9)
}
  0x1b   :  { %s3006_s29 = smov 256   ;;  %s3007_s30 = smov 16  }
  0x1c   :  { %25 = dma.hbm_to_vmem [thread:$0]  %s3179_s0, 256, %s20_s26, [#allocation3], %s3006_s29, %s3006_s29, %s3007_s30  }
  0x1d   :  { %s3008_s8 = smov [#allocation7]  }
  0x1e   :  { %s45_s9 = sshll.u32 %s3008_s8, 4  ;;  %s46_s9 = int_to_ptr.vmem [resolvable:$true] %s45_s9 }
  0x1f   :  { %s2942_s1 = scalar_lea.vmem %s46_s9, 16384  ;;  %p2947_p11 = scmp.lt.s32.totalorder %s46_s9, %s46_s9 }
  0x20   :  { %p2943_p10 = scmp.ne.s32.totalorder %s46_s9, %s2942_s1  ;;  %p2948_p12 = scmp.lt.s32.totalorder %s2942_s1, %s2942_s1 }
  0x22   :  { %p2949_p13 = por %p2948_p12, %p2947_p11 }
  0x24   :  { %p2950_p0 = pnand %p2949_p13, %p2943_p10 }
  0x26   :  { %2953 = shalt.err (!%p2950_p0)
}
  0x27   :  { %s3009_s10 = smov 512   ;;  %s3010_s11 = smov 32  }
  0x28   :  { %51 = dma.hbm_to_vmem [thread:$0]  %s3182_s3, 16384, %s46_s9, [#allocation6], %s3009_s10, %s3009_s10, %s3010_s11  }
  0x29   :  { %s3011_s14 = smov [#allocation8]  }
  0x2a   :  { %s58_s15 = sshll.u32 %s3011_s14, 4  ;;  %s59_s15 = int_to_ptr.vmem [resolvable:$true] %s58_s15 }
  0x2b   :  { %s2962_s0 = scalar_lea.vmem %s59_s15, 128  ;;  %p2967_p2 = scmp.lt.s32.totalorder %s59_s15, %s59_s15 }
  0x2c   :  { %p2963_p1 = scmp.ne.s32.totalorder %s59_s15, %s2962_s0  ;;  %p2968_p3 = scmp.lt.s32.totalorder %s2962_s0, %s2962_s0 }
  0x2e   :  { %p2969_p4 = por %p2968_p3, %p2967_p2 }
  0x30   :  { %p2970_p5 = pnand %p2969_p4, %p2963_p1 }
  0x32   :  { %2973 = shalt.err (!%p2970_p5)
}
  0x33   :  { %61 = dma.hbm_to_vmem [thread:$0]  %s3183_s4, 128, %s59_s15, [#allocation9]  }
  0x34   :  { %2994 = dma.done.wait [#allocation3], 2048  }
  0x35   :  { %2995 = vsyncadd [#allocation3], 4294965248 }
  0x36   :  { %2996 = dma.done.wait [#allocation6], 32768  }
  0x37   :  { %2997 = vsyncadd [#allocation6], 4294934528 }
  0x38   :  { %2998 = dma.done.wait [#allocation9], 128  }
  0x39   :  { %2999 = vsyncadd [#allocation9], 4294967168  ;;  %v2678_v0 = vld [vmem:[#allocation5 + $0x74] ss:$8 sps:$4 sm:$0xff]   ;;  %v2682_v2 = vld [vmem:[#allocation5 + $0x70] ss:$8 sps:$4 sm:$0xff]   ;;  %v113_v41 = vlaneseq }
  0x3a   :  { %v2680_v1 = vld [vmem:[#allocation5 + $0x174] ss:$8 sps:$4 sm:$0xff]   ;;  %1054 = vmatprep.subr.bf16.mxu0 %v2678_v0  ;;  %v2683_v3 = vld [vmem:[#allocation5 + $0x170] ss:$8 sps:$4 sm:$0xff]   ;;  %v2684_v4 = vld [vmem:[#allocation5 + $0x64] ss:$8 sps:$4 sm:$0xff]  }
  0x3b   :  { %1097 = vmatprep.subr.bf16.mxu1 %v2680_v1  ;;  %1055 = vmatpush1.bf16.msra.mxu0 %v2682_v2  ;;  %v2686_v5 = vld [vmem:[#allocation5 + $0x164] ss:$8 sps:$4 sm:$0xff]   ;;  %v2688_v6 = vld [vmem:[#allocation5 + $0x60] ss:$8 sps:$4 sm:$0xff]   ;;  %v2690_v8 = vld [vmem:[#allocation5 + $0x54] ss:$8 sps:$4 sm:$0xff]  }
  0x3c   :  { %1098 = vmatpush1.bf16.msra.mxu1 %v2683_v3  ;;  %1056 = vmatprep.subr.bf16.mxu0 %v2684_v4  ;;  %v2689_v7 = vld [vmem:[#allocation5 + $0x160] ss:$8 sps:$4 sm:$0xff]   ;;  %v2692_v9 = vld [vmem:[#allocation5 + $0x154] ss:$8 sps:$4 sm:$0xff]   ;;  %v2694_v10 = vld [vmem:[#allocation5 + $0x50] ss:$8 sps:$4 sm:$0xff]  }
  0x3d   :  { %1099 = vmatprep.subr.bf16.mxu1 %v2686_v5  ;;  %v2695_v11 = vld [vmem:[#allocation5 + $0x150] ss:$8 sps:$4 sm:$0xff]   ;;  %v2696_v12 = vld [vmem:[#allocation5 + $0x44] ss:$8 sps:$4 sm:$0xff]   ;;  %v2700_v14 = vld [vmem:[#allocation5 + $0x40] ss:$8 sps:$4 sm:$0xff]  }
  0x3e   :  { %v2698_v13 = vld [vmem:[#allocation5 + $0x144] ss:$8 sps:$4 sm:$0xff]   ;;  %v2701_v15 = vld [vmem:[#allocation5 + $0x140] ss:$8 sps:$4 sm:$0xff]   ;;  %v2702_v16 = vld [vmem:[#allocation5 + $0x34] ss:$8 sps:$4 sm:$0xff]  }
  0x3f   :  { %1057 = vmatpush1.bf16.msra.mxu0 %v2688_v6  ;;  %v2704_v17 = vld [vmem:[#allocation5 + $0x134] ss:$8 sps:$4 sm:$0xff]   ;;  %v2706_v18 = vld [vmem:[#allocation5 + $0x30] ss:$8 sps:$4 sm:$0xff]   ;;  %v2708_v20 = vld [vmem:[#allocation5 + $0x24] ss:$8 sps:$4 sm:$0xff]  }
  0x40   :  { %1100 = vmatpush1.bf16.msra.mxu1 %v2689_v7  ;;  %1058 = vmatprep.subr.bf16.mxu0 %v2690_v8  ;;  %v2707_v19 = vld [vmem:[#allocation5 + $0x130] ss:$8 sps:$4 sm:$0xff]   ;;  %v2710_v21 = vld [vmem:[#allocation5 + $0x124] ss:$8 sps:$4 sm:$0xff]   ;;  %v2712_v22 = vld [vmem:[#allocation5 + $0x20] ss:$8 sps:$4 sm:$0xff]  }
  0x41   :  { %1101 = vmatprep.subr.bf16.mxu1 %v2692_v9  ;;  %v2713_v23 = vld [vmem:[#allocation5 + $0x120] ss:$8 sps:$4 sm:$0xff]   ;;  %v2714_v24 = vld [vmem:[#allocation5 + $0x14] ss:$8 sps:$4 sm:$0xff]   ;;  %v2718_v26 = vld [vmem:[#allocation5 + $0x10] ss:$8 sps:$4 sm:$0xff]  }
  0x42   :  { %v2716_v25 = vld [vmem:[#allocation5 + $0x114] ss:$8 sps:$4 sm:$0xff]   ;;  %v2719_v27 = vld [vmem:[#allocation5 + $0x110] ss:$8 sps:$4 sm:$0xff]   ;;  %v2720_v28 = vld [vmem:[#allocation5 + $0x4] ss:$8 sps:$4 sm:$0xff]  }
  0x43   :  { %1059 = vmatpush1.bf16.msra.mxu0 %v2694_v10  ;;  %v2722_v29 = vld [vmem:[#allocation5 + $0x104] ss:$8 sps:$4 sm:$0xff]   ;;  %v2724_v30 = vld [vmem:[#allocation5] ss:$8 sps:$4 sm:$0xff]   ;;  %v2726_v32 = vld [vmem:[#allocation5 + $0xf4] ss:$8 sps:$4 sm:$0xff]  }
  0x44   :  { %1102 = vmatpush1.bf16.msra.mxu1 %v2695_v11  ;;  %1060 = vmatprep.subr.bf16.mxu0 %v2696_v12  ;;  %v2725_v31 = vld [vmem:[#allocation5 + $0x100] ss:$8 sps:$4 sm:$0xff]   ;;  %v2728_v33 = vld [vmem:[#allocation5 + $0x1f4] ss:$8 sps:$4 sm:$0xff]   ;;  %v2730_v34 = vld [vmem:[#allocation5 + $0xf0] ss:$8 sps:$4 sm:$0xff]  }
  0x45   :  { %1103 = vmatprep.subr.bf16.mxu1 %v2698_v13  ;;  %v2731_v35 = vld [vmem:[#allocation5 + $0x1f0] ss:$8 sps:$4 sm:$0xff]   ;;  %v2732_v36 = vld [vmem:[#allocation5 + $0xe4] ss:$8 sps:$4 sm:$0xff]   ;;  %v2736_v38 = vld [vmem:[#allocation5 + $0xe0] ss:$8 sps:$4 sm:$0xff]  }
  0x46   :  { %v2734_v37 = vld [vmem:[#allocation5 + $0x1e4] ss:$8 sps:$4 sm:$0xff]   ;;  %v3012_v39 = vmov 1983009808   ;;  %v2737_v42 = vld [vmem:[#allocation5 + $0x1e0] ss:$8 sps:$4 sm:$0xff]  }
  0x47   :  { %1061 = vmatpush1.bf16.msra.mxu0 %v2700_v14  ;;  %v111_v40 = vunpack.c.l.s4 %v3012_v39  ;;  %v2738_v43 = vld [vmem:[#allocation5 + $0xd4] ss:$8 sps:$4 sm:$0xff]   ;;  %v2742_v45 = vld [vmem:[#allocation5 + $0xd0] ss:$8 sps:$4 sm:$0xff]   ;;  %v3060_v48 = vshrl.u32 %v113_v41, 7 }
  0x48   :  { %1104 = vmatpush1.bf16.msra.mxu1 %v2701_v15  ;;  %1062 = vmatprep.subr.bf16.mxu0 %v2702_v16  ;;  %v2740_v44 = vld [vmem:[#allocation5 + $0x1d4] ss:$8 sps:$4 sm:$0xff]   ;;  %v2743_v46 = vld [vmem:[#allocation5 + $0x1d0] ss:$8 sps:$4 sm:$0xff]   ;;  %v2744_v49 = vld [vmem:[#allocation5 + $0xc4] ss:$8 sps:$4 sm:$0xff]  }
  0x49   :  { %1105 = vmatprep.subr.bf16.mxu1 %v2704_v17  ;;  %v112_v47 = vunpack.c.0.s8 %v111_v40  ;;  %v2746_v50 = vld [vmem:[#allocation5 + $0x1c4] ss:$8 sps:$4 sm:$0xff]   ;;  %v2748_v51 = vld [vmem:[#allocation5 + $0xc0] ss:$8 sps:$4 sm:$0xff]   ;;  %v2750_v53 = vld [vmem:[#allocation5 + $0xb4] ss:$8 sps:$4 sm:$0xff]  }
  0x4a   :  { %v2749_v52 = vld [vmem:[#allocation5 + $0x1c0] ss:$8 sps:$4 sm:$0xff]   ;;  %v2752_v54 = vld [vmem:[#allocation5 + $0x1b4] ss:$8 sps:$4 sm:$0xff]   ;;  %v2754_v58 = vld [vmem:[#allocation5 + $0xb0] ss:$8 sps:$4 sm:$0xff]  }
  0x4b   :  { %1063 = vmatpush1.bf16.msra.mxu0 %v2706_v18  ;;  %v3063_v55 = vsub.s32 %v112_v47, %v3060_v48  ;;  %v2774_v56 = vld [vmem:[#allocation2] ss:$16 sps:$4 sm:$0xff]   ;;  %v2782_v62 = vld [vmem:[#allocation2 + $0x4] ss:$16 sps:$4 sm:$0xff]  }
  0x4c   :  { %1106 = vmatpush1.bf16.msra.mxu1 %v2707_v19  ;;  %1064 = vmatprep.subr.bf16.mxu0 %v2708_v20  ;;  %v2776_v57 = vld [vmem:[#allocation2 + $0x20] ss:$16 sps:$4 sm:$0xff]   ;;  %v2783_v1 = vld [vmem:[#allocation2 + $0x24] ss:$16 sps:$4 sm:$0xff]  }
  0x4d   :  { %1107 = vmatprep.subr.bf16.mxu1 %v2710_v21  ;;  %v2755_v59 = vld [vmem:[#allocation5 + $0x1b0] ss:$8 sps:$4 sm:$0xff]   ;;  %v116_v63 = vrot.slane %v2774_v56, %v3063_v55  ;;  %v130_v0 = vrot.slane %v2776_v57, %v3063_v55  ;;  %v2784_v2 = vld [vmem:[#allocation2 + $0x44] ss:$16 sps:$4 sm:$0xff]   ;;  %v123_v7 = vrot.slane %v2782_v62, %v3063_v55  ;;  %v137_v10 = vrot.slane %v2783_v1, %v3063_v55  ;;  %v2760_v14 = vld [vmem:[#allocation5 + $0xa0] ss:$8 sps:$4 sm:$0xff]  }
  0x4e   :  { %v2778_v60 = vld [vmem:[#allocation2 + $0x40] ss:$16 sps:$4 sm:$0xff]   ;;  %v2785_v3 = vld [vmem:[#allocation2 + $0x64] ss:$16 sps:$4 sm:$0xff]   ;;  %v195_v11 = vrot.slane %v2784_v2, %v3063_v55 }
  0x4f   :  { %1065 = vmatpush1.bf16.msra.mxu0 %v2712_v22  ;;  %v2780_v61 = vld [vmem:[#allocation2 + $0x60] ss:$16 sps:$4 sm:$0xff]   ;;  %v2756_v4 = vld [vmem:[#allocation5 + $0xa4] ss:$8 sps:$4 sm:$0xff]   ;;  %v188_v5 = vrot.slane %v2778_v60, %v3063_v55  ;;  %v139_v9 = vcombine.high %v116_v63, %v130_v0  ;;  %v209_v13 = vrot.slane %v2785_v3, %v3063_v55  ;;  %v141_v16 = vcombine.high %v123_v7, %v137_v10  ;;  %v2762_v17 = vld [vmem:[#allocation5 + $0x94] ss:$8 sps:$4 sm:$0xff]  }
  0x50   :  { %1108 = vmatpush1.bf16.msra.mxu1 %v2713_v23  ;;  %1066 = vmatprep.subr.bf16.mxu0 %v2714_v24  ;;  %v202_v6 = vrot.slane %v2780_v61, %v3063_v55  ;;  %v2758_v8 = vld [vmem:[#allocation5 + $0x1a4] ss:$8 sps:$4 sm:$0xff]   ;;  %v2761_v15 = vld [vmem:[#allocation5 + $0x1a0] ss:$8 sps:$4 sm:$0xff]   ;;  %v2764_v20 = vld [vmem:[#allocation5 + $0x194] ss:$8 sps:$4 sm:$0xff]  }
  0x51   :  { %1109 = vmatprep.subr.bf16.mxu1 %v2716_v25  ;;  %v213_v19 = vcombine.high %v195_v11, %v209_v13  ;;  %v2766_v22 = vld [vmem:[#allocation5 + $0x90] ss:$8 sps:$4 sm:$0xff]   ;;  %v2768_v24 = vld [vmem:[#allocation5 + $0x84] ss:$8 sps:$4 sm:$0xff]   ;;  %v2792_v40 = vld [vmem:[#allocation5 + $0x260] ss:$8 sps:$4 sm:$0xff]  }
  0x52   :  { %v211_v12 = vcombine.high %v188_v5, %v202_v6  ;;  %v2767_v23 = vld [vmem:[#allocation5 + $0x190] ss:$8 sps:$4 sm:$0xff]   ;;  %v2770_v25 = vld [vmem:[#allocation5 + $0x184] ss:$8 sps:$4 sm:$0xff]   ;;  %v2795_v41 = vld [vmem:[#allocation5 + $0x360] ss:$8 sps:$4 sm:$0xff]  }
  0x53   :  { %1067 = vmatpush1.bf16.msra.mxu0 %v2718_v26  ;;  %v269_v21 = vpack.c.bf16 %v213_v19, %v141_v16  ;;  %v2772_v26 = vld [vmem:[#allocation5 + $0x80] ss:$8 sps:$4 sm:$0xff]   ;;  %v2797_v39 = vld [vmem:[#allocation5 + $0x364] ss:$8 sps:$4 sm:$0xff]   ;;  %v2824_v60 = vld [vmem:[#allocation5 + $0x214] ss:$8 sps:$4 sm:$0xff]  }
  0x54   :  { %1110 = vmatpush1.bf16.msra.mxu1 %v2719_v27  ;;  %1068 = vmatprep.subr.bf16.mxu0 %v2720_v28  ;;  %v267_v18 = vpack.c.bf16 %v211_v12, %v139_v9  ;;  %v2773_v27 = vld [vmem:[#allocation5 + $0x180] ss:$8 sps:$4 sm:$0xff]   ;;  %v138_v28 = vcombine.low %v116_v63, %v130_v0  ;;  %v2809_v47 = vld [vmem:[#allocation5 + $0x344] ss:$8 sps:$4 sm:$0xff]   ;;  %v2827_v61 = vld [vmem:[#allocation5 + $0x314] ss:$8 sps:$4 sm:$0xff]  }
  0x55   :  { %1111 = vmatprep.subr.bf16.mxu1 %v2722_v29  ;;  %1129 = vmatprep.mubr.bf16.mxu1 %v269_v21  ;;  %v210_v29 = vcombine.low %v188_v5, %v202_v6  ;;  %v2818_v56 = vld [vmem:[#allocation5 + $0x224] ss:$8 sps:$4 sm:$0xff]   ;;  %v2822_v62 = vld [vmem:[#allocation5 + $0x210] ss:$8 sps:$4 sm:$0xff]   ;;  %v2828_v2 = vld [vmem:[#allocation5 + $0x200] ss:$8 sps:$4 sm:$0xff]  }
  0x56   :  { %1086 = vmatprep.mubr.bf16.mxu0 %v267_v18  ;;  %v2821_v57 = vld [vmem:[#allocation5 + $0x324] ss:$8 sps:$4 sm:$0xff]   ;;  %v2825_v63 = vld [vmem:[#allocation5 + $0x310] ss:$8 sps:$4 sm:$0xff]   ;;  %v2831_v3 = vld [vmem:[#allocation5 + $0x300] ss:$8 sps:$4 sm:$0xff]  }
  0x57   :  { %1069 = vmatpush1.bf16.msra.mxu0 %v2724_v30  ;;  %v140_v30 = vcombine.low %v123_v7, %v137_v10  ;;  %v2830_v0 = vld [vmem:[#allocation5 + $0x204] ss:$8 sps:$4 sm:$0xff]   ;;  %v2839_v5 = vld [vmem:[#allocation5 + $0x3f4] ss:$8 sps:$4 sm:$0xff]   ;;  %v2882_v6 = vld [vmem:[#allocation2 + $0x8] ss:$16 sps:$4 sm:$0xff]  }
  0x58   :  { %1112 = vmatpush1.bf16.msra.mxu1 %v2725_v31  ;;  %1070 = vmatprep.subr.bf16.mxu0 %v2726_v32  ;;  %v212_v31 = vcombine.low %v195_v11, %v209_v13  ;;  %v2788_v32 = vld [vmem:[#allocation5 + $0x274] ss:$8 sps:$4 sm:$0xff]   ;;  %v2833_v1 = vld [vmem:[#allocation5 + $0x304] ss:$8 sps:$4 sm:$0xff]   ;;  %v2884_v7 = vld [vmem:[#allocation2 + $0x28] ss:$16 sps:$4 sm:$0xff]   ;;  %v3074_v11 = vrot.slane %v2882_v6, %v3063_v55 }
  0x59   :  { %1113 = vmatprep.subr.bf16.mxu1 %v2728_v33  ;;  %v2791_v33 = vld [vmem:[#allocation5 + $0x374] ss:$8 sps:$4 sm:$0xff]   ;;  %v2888_v9 = vld [vmem:[#allocation2 + $0x68] ss:$16 sps:$4 sm:$0xff]   ;;  %v3077_v12 = vrot.slane %v2884_v7, %v3063_v55  ;;  %v2842_v21 = vld [vmem:[#allocation5 + $0x2e4] ss:$8 sps:$4 sm:$0xff]  }
  0x5a   :  { %v2890_v10 = vld [vmem:[#allocation2 + $0xc] ss:$16 sps:$4 sm:$0xff]   ;;  %v2834_v16 = vld [vmem:[#allocation5 + $0x2f0] ss:$8 sps:$4 sm:$0xff]   ;;  %v3083_v19 = vrot.slane %v2888_v9, %v3063_v55  ;;  %v1280_v7 = vld [vmem:[#allocation7 + $0x180] sm:$0xff] }
  0x5b   :  { %1071 = vmatpush2.bf16.msra.mxu0 %v2730_v34  ;;  %v266_v34 = vpack.c.bf16 %v210_v29, %v138_v28  ;;  %v2891_v13 = vld [vmem:[#allocation2 + $0x2c] ss:$16 sps:$4 sm:$0xff]   ;;  %v2840_v29 = vld [vmem:[#allocation5 + $0x2e0] ss:$8 sps:$4 sm:$0xff]  }
  0x5c   :  { %1114 = vmatpush2.bf16.msra.mxu1 %v2731_v35  ;;  %1072 = vmatprep.subr.bf16.mxu0 %v2732_v36  ;;  %v268_v35 = vpack.c.bf16 %v212_v31, %v140_v30  ;;  %v2786_v36 = vld [vmem:[#allocation5 + $0x270] ss:$8 sps:$4 sm:$0xff]   ;;  %v2843_v30 = vld [vmem:[#allocation5 + $0x3e0] ss:$8 sps:$4 sm:$0xff]  }
  0x5d   :  { %1115 = vmatprep.subr.bf16.mxu1 %v2734_v37  ;;  %v2789_v37 = vld [vmem:[#allocation5 + $0x370] ss:$8 sps:$4 sm:$0xff]   ;;  %v1293_v6 = vld [vmem:[#allocation7 + $0x1e8] sm:$0xff] }
  0x5f   :  { %1073 = vmatpush2.bf16.msra.mxu0 %v2736_v38  ;;  %v2794_v38 = vld [vmem:[#allocation5 + $0x264] ss:$8 sps:$4 sm:$0xff]  }
  0x60   :  { %1116 = vmatpush2.bf16.msra.mxu1 %v2737_v42  ;;  %1074 = vmatprep.subr.bf16.mxu0 %v2738_v43  ;;  %v2800_v42 = vld [vmem:[#allocation5 + $0x254] ss:$8 sps:$4 sm:$0xff]  }
  0x61   :  { %1117 = vmatprep.subr.bf16.mxu1 %v2740_v44  ;;  %v2803_v43 = vld [vmem:[#allocation5 + $0x354] ss:$8 sps:$4 sm:$0xff]   ;;  %v2798_v44 = vld [vmem:[#allocation5 + $0x250] ss:$8 sps:$4 sm:$0xff]  }
  0x63   :  { %1075 = vmatpush2.bf16.msra.mxu0 %v2742_v45  ;;  %v2801_v45 = vld [vmem:[#allocation5 + $0x350] ss:$8 sps:$4 sm:$0xff]  }
  0x64   :  { %1118 = vmatpush2.bf16.msra.mxu1 %v2743_v46  ;;  %1076 = vmatprep.subr.bf16.mxu0 %v2744_v49  ;;  %v2806_v46 = vld [vmem:[#allocation5 + $0x244] ss:$8 sps:$4 sm:$0xff]   ;;  %v2804_v49 = vld [vmem:[#allocation5 + $0x240] ss:$8 sps:$4 sm:$0xff]  }
  0x65   :  { %1119 = vmatprep.subr.bf16.mxu1 %v2746_v50  ;;  %v2807_v50 = vld [vmem:[#allocation5 + $0x340] ss:$8 sps:$4 sm:$0xff]  }
  0x67   :  { %1077 = vmatpush2.bf16.msra.mxu0 %v2748_v51  ;;  %v2812_v51 = vld [vmem:[#allocation5 + $0x234] ss:$8 sps:$4 sm:$0xff]  }
  0x68   :  { %1120 = vmatpush2.bf16.msra.mxu1 %v2749_v52  ;;  %1078 = vmatprep.subr.bf16.mxu0 %v2750_v53  ;;  %v2815_v52 = vld [vmem:[#allocation5 + $0x334] ss:$8 sps:$4 sm:$0xff]   ;;  %v2810_v53 = vld [vmem:[#allocation5 + $0x230] ss:$8 sps:$4 sm:$0xff]  }
  0x69   :  { %1121 = vmatprep.subr.bf16.mxu1 %v2752_v54  ;;  %v2813_v54 = vld [vmem:[#allocation5 + $0x330] ss:$8 sps:$4 sm:$0xff]  }
  0x6b   :  { %1079 = vmatpush2.bf16.msra.mxu0 %v2754_v58  ;;  %v2816_v58 = vld [vmem:[#allocation5 + $0x220] ss:$8 sps:$4 sm:$0xff]  }
  0x6c   :  { %1122 = vmatpush2.bf16.msra.mxu1 %v2755_v59  ;;  %1080 = vmatprep.subr.bf16.mxu0 %v2756_v4  ;;  %v2819_v59 = vld [vmem:[#allocation5 + $0x320] ss:$8 sps:$4 sm:$0xff]   ;;  %v2836_v4 = vld [vmem:[#allocation5 + $0x2f4] ss:$8 sps:$4 sm:$0xff]  }
  0x6d   :  { %1123 = vmatprep.subr.bf16.mxu1 %v2758_v8  ;;  %v2886_v8 = vld [vmem:[#allocation2 + $0x48] ss:$16 sps:$4 sm:$0xff]  }
  0x6e   :  { %v3080_v18 = vrot.slane %v2886_v8, %v3063_v55  ;;  %v1284_v8 = vld [vmem:[#allocation7 + $0x1a0] sm:$0xff] }
  0x6f   :  { %1081 = vmatpush2.bf16.msra.mxu0 %v2760_v14  ;;  %v2892_v14 = vld [vmem:[#allocation2 + $0x4c] ss:$16 sps:$4 sm:$0xff]  }
  0x70   :  { %1124 = vmatpush2.bf16.msra.mxu1 %v2761_v15  ;;  %1082 = vmatprep.subr.bf16.mxu0 %v2762_v17  ;;  %v2893_v15 = vld [vmem:[#allocation2 + $0x6c] ss:$16 sps:$4 sm:$0xff]   ;;  %v2837_v17 = vld [vmem:[#allocation5 + $0x3f0] ss:$8 sps:$4 sm:$0xff]  }
  0x71   :  { %1125 = vmatprep.subr.bf16.mxu1 %v2764_v20  ;;  %v3086_v20 = vrot.slane %v2890_v10, %v3063_v55 }
  0x73   :  { %1083 = vmatpush2.bf16.msra.mxu0 %v2766_v22  ;;  %v2845_v22 = vld [vmem:[#allocation5 + $0x3e4] ss:$8 sps:$4 sm:$0xff]  }
  0x74   :  { %1126 = vmatpush2.bf16.msra.mxu1 %v2767_v23  ;;  %1084 = vmatprep.subr.bf16.mxu0 %v2768_v24  ;;  %v175_v23 = vcombine.high %v3074_v11, %v3077_v12  ;;  %v3091_v24 = vrot.slane %v2891_v13, %v3063_v55  ;;  %v1285_v13 = vld [vmem:[#allocation7 + $0x1a8] sm:$0xff] }
  0x75   :  { %1127 = vmatprep.subr.bf16.mxu1 %v2770_v25  ;;  %v3094_v25 = vrot.slane %v2892_v14, %v3063_v55  ;;  %v1272_v14 = vld [vmem:[#allocation7 + $0x140] sm:$0xff] }
  0x76   :  { %v177_v28 = vcombine.high %v3086_v20, %v3091_v24 }
  0x77   :  { %1085 = vmatpush2.bf16.msra.mxu0 %v2772_v26  ;;  %v247_v26 = vcombine.high %v3080_v18, %v3083_v19 }
  0x78   :  { %1128 = vmatpush2.bf16.msra.mxu1 %v2773_v27  ;;  %1140 = vmatprep.subr.bf16.mxu0 %v2788_v32  ;;  %v3099_v27 = vrot.slane %v2893_v15, %v3063_v55  ;;  %v2846_v55 = vld [vmem:[#allocation5 + $0x2d0] ss:$8 sps:$4 sm:$0xff]  }
  0x79   :  { %1183 = vmatprep.subr.bf16.mxu1 %v2791_v33  ;;  %v271_v31 = vpack.c.bf16 %v247_v26, %v175_v23  ;;  %v2848_v33 = vld [vmem:[#allocation5 + $0x2d4] ss:$8 sps:$4 sm:$0xff]   ;;  %v1264_v23 = vld [vmem:[#allocation7 + $0x100] sm:$0xff]  ;;  %v1269_v26 = vld [vmem:[#allocation7 + $0x128] sm:$0xff] }
  0x7a   :  { %1087 = vmatmul.mubr.bf16.vlgmr.msra.gmra.mxu0 %v266_v34  ;;  %v249_v32 = vcombine.high %v3094_v25, %v3099_v27  ;;  %v2851_v34 = vld [vmem:[#allocation5 + $0x3d4] ss:$8 sps:$4 sm:$0xff]  }
  0x7b   :  { %1130 = vmatmul.mubr.bf16.vlgmr.msra.gmra.mxu1 %v268_v35  ;;  %1141 = vmatpush1.bf16.msra.mxu0 %v2786_v36  ;;  %v2849_v36 = vld [vmem:[#allocation5 + $0x3d0] ss:$8 sps:$4 sm:$0xff]  }
  0x7c   :  { %1184 = vmatpush1.bf16.msra.mxu1 %v2789_v37  ;;  %1142 = vmatprep.subr.bf16.mxu0 %v2794_v38  ;;  %v273_v35 = vpack.c.bf16 %v249_v32, %v177_v28  ;;  %v2854_v37 = vld [vmem:[#allocation5 + $0x2c4] ss:$8 sps:$4 sm:$0xff]  }
  0x7d   :  { %1185 = vmatprep.subr.bf16.mxu1 %v2797_v39  ;;  %1172 = vmatprep.mubr.bf16.mxu0 %v271_v31  ;;  %v2857_v38 = vld [vmem:[#allocation5 + $0x3c4] ss:$8 sps:$4 sm:$0xff]   ;;  %v2852_v39 = vld [vmem:[#allocation5 + $0x2c0] ss:$8 sps:$4 sm:$0xff]  }
  0x7e   :  { %1215 = vmatprep.mubr.bf16.mxu1 %v273_v35  ;;  %v1256_v31 = vld [vmem:[#allocation7 + $0xc0] sm:$0xff] }
  0x7f   :  { %1143 = vmatpush1.bf16.msra.mxu0 %v2792_v40  ;;  %v2855_v40 = vld [vmem:[#allocation5 + $0x3c0] ss:$8 sps:$4 sm:$0xff]  }
  0x80   :  { %1186 = vmatpush1.bf16.msra.mxu1 %v2795_v41  ;;  %1144 = vmatprep.subr.bf16.mxu0 %v2800_v42  ;;  %v2860_v41 = vld [vmem:[#allocation5 + $0x2b4] ss:$8 sps:$4 sm:$0xff]   ;;  %v1260_v32 = vld [vmem:[#allocation7 + $0xe0] sm:$0xff] }
  0x81   :  { %1187 = vmatprep.subr.bf16.mxu1 %v2803_v43  ;;  %v2863_v42 = vld [vmem:[#allocation5 + $0x3b4] ss:$8 sps:$4 sm:$0xff]   ;;  %v2858_v43 = vld [vmem:[#allocation5 + $0x2b0] ss:$8 sps:$4 sm:$0xff]  }
  0x83   :  { %1145 = vmatpush1.bf16.msra.mxu0 %v2798_v44  ;;  %v2861_v44 = vld [vmem:[#allocation5 + $0x3b0] ss:$8 sps:$4 sm:$0xff]  }
  0x84   :  { %1188 = vmatpush1.bf16.msra.mxu1 %v2801_v45  ;;  %1146 = vmatprep.subr.bf16.mxu0 %v2806_v46  ;;  %v2866_v45 = vld [vmem:[#allocation5 + $0x2a4] ss:$8 sps:$4 sm:$0xff]  }
  0x85   :  { %1189 = vmatprep.subr.bf16.mxu1 %v2809_v47  ;;  %v2869_v46 = vld [vmem:[#allocation5 + $0x3a4] ss:$8 sps:$4 sm:$0xff]   ;;  %v2864_v47 = vld [vmem:[#allocation5 + $0x2a0] ss:$8 sps:$4 sm:$0xff]  }
  0x87   :  { %1147 = vmatpush1.bf16.msra.mxu0 %v2804_v49  ;;  %v2867_v49 = vld [vmem:[#allocation5 + $0x3a0] ss:$8 sps:$4 sm:$0xff]  }
  0x88   :  { %1190 = vmatpush1.bf16.msra.mxu1 %v2807_v50  ;;  %1148 = vmatprep.subr.bf16.mxu0 %v2812_v51  ;;  %v2872_v50 = vld [vmem:[#allocation5 + $0x294] ss:$8 sps:$4 sm:$0xff]  }
  0x89   :  { %1191 = vmatprep.subr.bf16.mxu1 %v2815_v52  ;;  %v2875_v51 = vld [vmem:[#allocation5 + $0x394] ss:$8 sps:$4 sm:$0xff]   ;;  %v2870_v52 = vld [vmem:[#allocation5 + $0x290] ss:$8 sps:$4 sm:$0xff]  }
  0x8b   :  { %1149 = vmatpush1.bf16.msra.mxu0 %v2810_v53  ;;  %v2873_v53 = vld [vmem:[#allocation5 + $0x390] ss:$8 sps:$4 sm:$0xff]  }
  0x8c   :  { %1192 = vmatpush1.bf16.msra.mxu1 %v2813_v54  ;;  %1150 = vmatprep.subr.bf16.mxu0 %v2818_v56  ;;  %v2878_v54 = vld [vmem:[#allocation5 + $0x284] ss:$8 sps:$4 sm:$0xff]  }
  0x8d   :  { %1193 = vmatprep.subr.bf16.mxu1 %v2821_v57  ;;  %v2881_v56 = vld [vmem:[#allocation5 + $0x384] ss:$8 sps:$4 sm:$0xff]   ;;  %v174_v57 = vcombine.low %v3074_v11, %v3077_v12  ;;  %v2578_v11 = vcombine.high %v1280_v7, %v1284_v8 }
  0x8e   :  { %v1281_v12 = vld [vmem:[#allocation7 + $0x188] sm:$0xff] }
  0x8f   :  { %1151 = vmatpush1.bf16.msra.mxu0 %v2816_v58  ;;  %v246_v58 = vcombine.low %v3080_v18, %v3083_v19  ;;  %v2580_v15 = vcombine.high %v1281_v12, %v1285_v13  ;;  %v1277_v18 = vld [vmem:[#allocation7 + $0x168] sm:$0xff]  ;;  %v2577_v19 = vcombine.low %v1280_v7, %v1284_v8  ;;  %v1344_v8 = vld [vmem:[#allocation7 + $0x380] sm:$0xff] }
  0x90   :  { %1194 = vmatpush1.bf16.msra.mxu1 %v2819_v59  ;;  %1152 = vmatprep.subr.bf16.mxu0 %v2824_v60  ;;  %v176_v59 = vcombine.low %v3086_v20, %v3091_v24  ;;  %v248_v60 = vcombine.low %v3094_v25, %v3099_v27  ;;  %v2579_v20 = vcombine.low %v1281_v12, %v1285_v13  ;;  %v1268_v24 = vld [vmem:[#allocation7 + $0x120] sm:$0xff]  ;;  %v1265_v25 = vld [vmem:[#allocation7 + $0x108] sm:$0xff] }
  0x91   :  { %1195 = vmatprep.subr.bf16.mxu1 %v2827_v61  ;;  %v2876_v61 = vld [vmem:[#allocation5 + $0x280] ss:$8 sps:$4 sm:$0xff]   ;;  %v2561_v35 = vcombine.low %v1264_v23, %v1268_v24 }
  0x93   :  { %1153 = vmatpush1.bf16.msra.mxu0 %v2822_v62  ;;  %v2879_v62 = vld [vmem:[#allocation5 + $0x380] ss:$8 sps:$4 sm:$0xff]  }
  0x94   :  { %1196 = vmatpush1.bf16.msra.mxu1 %v2825_v63  ;;  %1154 = vmatprep.subr.bf16.mxu0 %v2830_v0  ;;  %v270_v63 = vpack.c.bf16 %v246_v58, %v174_v57  ;;  %v272_v0 = vpack.c.bf16 %v248_v60, %v176_v59  ;;  %v1236_v57 = vld [vmem:[#allocation7 + $0x20] sm:$0xff]  ;;  %v1233_v58 = vld [vmem:[#allocation7 + $0x8] sm:$0xff] }
  0x95   :  { %1197 = vmatprep.subr.bf16.mxu1 %v2833_v1  ;;  %v1288_v1 = vld [vmem:[#allocation7 + $0x1c0] sm:$0xff]  ;;  %v1237_v59 = vld [vmem:[#allocation7 + $0x28] sm:$0xff] }
  0x97   :  { %1155 = vmatpush1.bf16.msra.mxu0 %v2828_v2  ;;  %v1292_v2 = vld [vmem:[#allocation7 + $0x1e0] sm:$0xff] }
  0x98   :  { %1198 = vmatpush1.bf16.msra.mxu1 %v2831_v3  ;;  %1156 = vmatprep.subr.bf16.mxu0 %v2836_v4  ;;  %v1289_v3 = vld [vmem:[#allocation7 + $0x1c8] sm:$0xff]  ;;  %v2585_v4 = vcombine.low %v1288_v1, %v1292_v2 }
  0x99   :  { %1199 = vmatprep.subr.bf16.mxu1 %v2839_v5  ;;  %v2586_v5 = vcombine.high %v1288_v1, %v1292_v2  ;;  %v2587_v9 = vcombine.low %v1289_v3, %v1293_v6  ;;  %v2588_v10 = vcombine.high %v1289_v3, %v1293_v6  ;;  %v1356_v1 = vld [vmem:[#allocation7 + $0x3e0] sm:$0xff]  ;;  %v1353_v2 = vld [vmem:[#allocation7 + $0x3c8] sm:$0xff] }
  0x9a   :  { %v1357_v3 = vld [vmem:[#allocation7 + $0x3e8] sm:$0xff] }
  0x9b   :  { %1157 = vmatpush2.bf16.msra.mxu0 %v2834_v16  ;;  %v1276_v16 = vld [vmem:[#allocation7 + $0x160] sm:$0xff]  ;;  %v2652_v7 = vcombine.high %v1353_v2, %v1357_v3  ;;  %v2651_v13 = vcombine.low %v1353_v2, %v1357_v3  ;;  %v3113_v3 = vld [vmem:[#allocation7 + $0x1d0] sm:$0xff] }
  0x9c   :  { %1200 = vmatpush2.bf16.msra.mxu1 %v2837_v17  ;;  %1158 = vmatprep.subr.bf16.mxu0 %v2842_v21  ;;  %v1273_v17 = vld [vmem:[#allocation7 + $0x148] sm:$0xff]  ;;  %v2570_v21 = vcombine.high %v1272_v14, %v1276_v16  ;;  %v2569_v27 = vcombine.low %v1272_v14, %v1276_v16  ;;  %v1336_v16 = vld [vmem:[#allocation7 + $0x340] sm:$0xff] }
  0x9d   :  { %1201 = vmatprep.subr.bf16.mxu1 %v2845_v22  ;;  %v2572_v22 = vcombine.high %v1273_v17, %v1277_v18  ;;  %v2571_v28 = vcombine.low %v1273_v17, %v1277_v18  ;;  %v1340_v17 = vld [vmem:[#allocation7 + $0x360] sm:$0xff]  ;;  %v1337_v18 = vld [vmem:[#allocation7 + $0x348] sm:$0xff] }
  0x9f   :  { %1159 = vmatpush2.bf16.msra.mxu0 %v2840_v29  ;;  %v2562_v29 = vcombine.high %v1264_v23, %v1268_v24  ;;  %v1328_v24 = vld [vmem:[#allocation7 + $0x300] sm:$0xff] }
  0xa0   :  { %1202 = vmatpush2.bf16.msra.mxu1 %v2843_v30  ;;  %1160 = vmatprep.subr.bf16.mxu0 %v2848_v33  ;;  %v2564_v30 = vcombine.high %v1265_v25, %v1269_v26  ;;  %v1257_v33 = vld [vmem:[#allocation7 + $0xc8] sm:$0xff] }
  0xa1   :  { %1203 = vmatprep.subr.bf16.mxu1 %v2851_v34  ;;  %v1261_v34 = vld [vmem:[#allocation7 + $0xe8] sm:$0xff] }
  0xa3   :  { %1161 = vmatpush2.bf16.msra.mxu0 %v2846_v55  ;;  %v2563_v55 = vcombine.low %v1265_v25, %v1269_v26  ;;  %v1332_v25 = vld [vmem:[#allocation7 + $0x320] sm:$0xff]  ;;  %v1329_v26 = vld [vmem:[#allocation7 + $0x308] sm:$0xff] }
  0xa4   :  { %1204 = vmatpush2.bf16.msra.mxu1 %v2849_v36  ;;  %1162 = vmatprep.subr.bf16.mxu0 %v2854_v37  ;;  %v2554_v36 = vcombine.high %v1256_v31, %v1260_v32  ;;  %v2556_v37 = vcombine.high %v1257_v33, %v1261_v34 }
  0xa5   :  { %1205 = vmatprep.subr.bf16.mxu1 %v2857_v38  ;;  %v1248_v38 = vld [vmem:[#allocation7 + $0x80] sm:$0xff] }
  0xa7   :  { %1163 = vmatpush2.bf16.msra.mxu0 %v2852_v39  ;;  %v1252_v39 = vld [vmem:[#allocation7 + $0xa0] sm:$0xff] }
  0xa8   :  { %1206 = vmatpush2.bf16.msra.mxu1 %v2855_v40  ;;  %1164 = vmatprep.subr.bf16.mxu0 %v2860_v41  ;;  %v1249_v40 = vld [vmem:[#allocation7 + $0x88] sm:$0xff] }
  0xa9   :  { %1207 = vmatprep.subr.bf16.mxu1 %v2863_v42  ;;  %v1253_v41 = vld [vmem:[#allocation7 + $0xa8] sm:$0xff]  ;;  %v2553_v42 = vcombine.low %v1256_v31, %v1260_v32  ;;  %v1320_v32 = vld [vmem:[#allocation7 + $0x2c0] sm:$0xff] }
  0xab   :  { %1165 = vmatpush2.bf16.msra.mxu0 %v2858_v43  ;;  %v2555_v43 = vcombine.low %v1257_v33, %v1261_v34  ;;  %v1324_v33 = vld [vmem:[#allocation7 + $0x2e0] sm:$0xff]  ;;  %v1321_v34 = vld [vmem:[#allocation7 + $0x2c8] sm:$0xff] }
  0xac   :  { %1208 = vmatpush2.bf16.msra.mxu1 %v2861_v44  ;;  %1166 = vmatprep.subr.bf16.mxu0 %v2866_v45  ;;  %v2546_v44 = vcombine.high %v1248_v38, %v1252_v39  ;;  %v2548_v45 = vcombine.high %v1249_v40, %v1253_v41 }
  0xad   :  { %1209 = vmatprep.subr.bf16.mxu1 %v2869_v46  ;;  %v1240_v46 = vld [vmem:[#allocation7 + $0x40] sm:$0xff] }
  0xaf   :  { %1167 = vmatpush2.bf16.msra.mxu0 %v2864_v47  ;;  %v1244_v47 = vld [vmem:[#allocation7 + $0x60] sm:$0xff] }
  0xb0   :  { %1210 = vmatpush2.bf16.msra.mxu1 %v2867_v49  ;;  %1168 = vmatprep.subr.bf16.mxu0 %v2872_v50  ;;  %v1241_v49 = vld [vmem:[#allocation7 + $0x48] sm:$0xff]  ;;  %v2537_v60 = vcombine.low %v1240_v46, %v1244_v47 }
  0xb1   :  { %1211 = vmatprep.subr.bf16.mxu1 %v2875_v51  ;;  %v1245_v50 = vld [vmem:[#allocation7 + $0x68] sm:$0xff]  ;;  %v2545_v51 = vcombine.low %v1248_v38, %v1252_v39  ;;  %v2617_v39 = vcombine.low %v1320_v32, %v1324_v33 }
  0xb3   :  { %1169 = vmatpush2.bf16.msra.mxu0 %v2870_v52  ;;  %v2547_v52 = vcombine.low %v1249_v40, %v1253_v41  ;;  %v1312_v41 = vld [vmem:[#allocation7 + $0x280] sm:$0xff] }
  0xb4   :  { %1212 = vmatpush2.bf16.msra.mxu1 %v2873_v53  ;;  %1170 = vmatprep.subr.bf16.mxu0 %v2878_v54  ;;  %v2538_v53 = vcombine.high %v1240_v46, %v1244_v47  ;;  %v2540_v54 = vcombine.high %v1241_v49, %v1245_v50 }
  0xb5   :  { %1213 = vmatprep.subr.bf16.mxu1 %v2881_v56  ;;  %v1232_v56 = vld [vmem:[#allocation7] sm:$0xff] }
  0xb7   :  { %1171 = vmatpush2.bf16.msra.mxu0 %v2876_v61  ;;  %v2539_v61 = vcombine.low %v1241_v49, %v1245_v50  ;;  %v1304_v50 = vld [vmem:[#allocation7 + $0x240] sm:$0xff] }
  0xb8   :  { %1214 = vmatpush2.bf16.msra.mxu1 %v2879_v62  ;;  %2042 = vmatprep.subr.bf16.mxu0 %v2586_v5  ;;  %v2530_v62 = vcombine.high %v1232_v56, %v1236_v57  ;;  %v2531_v5 = vcombine.low %v1233_v58, %v1237_v59 }
  0xb9   :  { %2085 = vmatprep.subr.bf16.mxu1 %v2588_v10  ;;  %v1345_v10 = vld [vmem:[#allocation7 + $0x388] sm:$0xff] }
  0xba   :  { %1173 = vmatmul.mubr.bf16.vlgmr.msra.gmra.mxu0 %v270_v63  ;;  %v2532_v63 = vcombine.high %v1233_v58, %v1237_v59  ;;  %v1296_v59 = vld [vmem:[#allocation7 + $0x200] sm:$0xff] }
  0xbb   :  { %1216 = vmatmul.mubr.bf16.vlgmr.msra.gmra.mxu1 %v272_v0  ;;  %2043 = vmatpush1.bf16.msra.mxu0 %v2585_v4  ;;  %v1352_v0 = vld [vmem:[#allocation7 + $0x3c0] sm:$0xff]  ;;  %v2529_v4 = vcombine.low %v1232_v56, %v1236_v57 }
  0xbc   :  { %2086 = vmatpush1.bf16.msra.mxu1 %v2587_v9  ;;  %2044 = vmatprep.subr.bf16.mxu0 %v2578_v11  ;;  %v2650_v6 = vcombine.high %v1352_v0, %v1356_v1  ;;  %v1348_v9 = vld [vmem:[#allocation7 + $0x3a0] sm:$0xff]  ;;  %v1349_v11 = vld [vmem:[#allocation7 + $0x3a8] sm:$0xff]  ;;  %v2649_v12 = vcombine.low %v1352_v0, %v1356_v1 }
  0xbd   :  { %2087 = vmatprep.subr.bf16.mxu1 %v2580_v15  ;;  %v2642_v14 = vcombine.high %v1344_v8, %v1348_v9  ;;  %v2644_v15 = vcombine.high %v1345_v10, %v1349_v11 }
  0xbf   :  { %2045 = vmatpush1.bf16.msra.mxu0 %v2577_v19  ;;  %v1341_v19 = vld [vmem:[#allocation7 + $0x368] sm:$0xff] }
  0xc0   :  { %2088 = vmatpush1.bf16.msra.mxu1 %v2579_v20  ;;  %2046 = vmatprep.subr.bf16.mxu0 %v2570_v21  ;;  %v2641_v20 = vcombine.low %v1344_v8, %v1348_v9  ;;  %v2643_v21 = vcombine.low %v1345_v10, %v1349_v11  ;;  %v2636_v23 = vcombine.high %v1337_v18, %v1341_v19 }
  0xc1   :  { %2089 = vmatprep.subr.bf16.mxu1 %v2572_v22  ;;  %v2634_v22 = vcombine.high %v1336_v16, %v1340_v17 }
  0xc3   :  { %2047 = vmatpush1.bf16.msra.mxu0 %v2569_v27  ;;  %v1333_v27 = vld [vmem:[#allocation7 + $0x328] sm:$0xff] }
  0xc4   :  { %2090 = vmatpush1.bf16.msra.mxu1 %v2571_v28  ;;  %2048 = vmatprep.subr.bf16.mxu0 %v2562_v29  ;;  %v2633_v28 = vcombine.low %v1336_v16, %v1340_v17  ;;  %v2635_v29 = vcombine.low %v1337_v18, %v1341_v19  ;;  %v2628_v31 = vcombine.high %v1329_v26, %v1333_v27 }
  0xc5   :  { %2091 = vmatprep.subr.bf16.mxu1 %v2564_v30  ;;  %v2626_v30 = vcombine.high %v1328_v24, %v1332_v25 }
  0xc7   :  { %2049 = vmatpush1.bf16.msra.mxu0 %v2561_v35  ;;  %v1325_v35 = vld [vmem:[#allocation7 + $0x2e8] sm:$0xff] }
  0xc8   :  { %2092 = vmatpush1.bf16.msra.mxu1 %v2563_v55  ;;  %2050 = vmatprep.subr.bf16.mxu0 %v2554_v36  ;;  %v2625_v55 = vcombine.low %v1328_v24, %v1332_v25  ;;  %v2627_v36 = vcombine.low %v1329_v26, %v1333_v27  ;;  %v2620_v38 = vcombine.high %v1321_v34, %v1325_v35 }
  0xc9   :  { %2093 = vmatprep.subr.bf16.mxu1 %v2556_v37  ;;  %v2618_v37 = vcombine.high %v1320_v32, %v1324_v33  ;;  %v2619_v40 = vcombine.low %v1321_v34, %v1325_v35 }
  0xcb   :  { %2051 = vmatpush1.bf16.msra.mxu0 %v2553_v42  ;;  %v1316_v42 = vld [vmem:[#allocation7 + $0x2a0] sm:$0xff] }
  0xcc   :  { %2094 = vmatpush1.bf16.msra.mxu1 %v2555_v43  ;;  %2052 = vmatprep.subr.bf16.mxu0 %v2546_v44  ;;  %v1313_v43 = vld [vmem:[#allocation7 + $0x288] sm:$0xff]  ;;  %v2610_v44 = vcombine.high %v1312_v41, %v1316_v42  ;;  %v2609_v46 = vcombine.low %v1312_v41, %v1316_v42 }
  0xcd   :  { %2095 = vmatprep.subr.bf16.mxu1 %v2548_v45  ;;  %v1317_v45 = vld [vmem:[#allocation7 + $0x2a8] sm:$0xff] }
  0xce   :  { %v2611_v47 = vcombine.low %v1313_v43, %v1317_v45  ;;  %v2612_v49 = vcombine.high %v1313_v43, %v1317_v45 }
  0xcf   :  { %2053 = vmatpush1.bf16.msra.mxu0 %v2545_v51  ;;  %v1308_v51 = vld [vmem:[#allocation7 + $0x260] sm:$0xff] }
  0xd0   :  { %2096 = vmatpush1.bf16.msra.mxu1 %v2547_v52  ;;  %2054 = vmatprep.subr.bf16.mxu0 %v2538_v53  ;;  %v1305_v52 = vld [vmem:[#allocation7 + $0x248] sm:$0xff]  ;;  %v2602_v53 = vcombine.high %v1304_v50, %v1308_v51  ;;  %v2601_v56 = vcombine.low %v1304_v50, %v1308_v51  ;;  %v1282_v51 = vld [vmem:[#allocation7 + $0x190] sm:$0xff] }
  0xd1   :  { %2097 = vmatprep.subr.bf16.mxu1 %v2540_v54  ;;  %v1309_v54 = vld [vmem:[#allocation7 + $0x268] sm:$0xff] }
  0xd2   :  { %v2603_v57 = vcombine.low %v1305_v52, %v1309_v54  ;;  %v2604_v58 = vcombine.high %v1305_v52, %v1309_v54  ;;  %v1283_v54 = vld [vmem:[#allocation7 + $0x198] sm:$0xff] }
  0xd3   :  { %2055 = vmatpush1.bf16.msra.mxu0 %v2537_v60  ;;  %v1300_v60 = vld [vmem:[#allocation7 + $0x220] sm:$0xff] }
  0xd4   :  { %2098 = vmatpush1.bf16.msra.mxu1 %v2539_v61  ;;  %2056 = vmatprep.subr.bf16.mxu0 %v2530_v62  ;;  %v1297_v61 = vld [vmem:[#allocation7 + $0x208] sm:$0xff]  ;;  %v2594_v62 = vcombine.high %v1296_v59, %v1300_v60  ;;  %v2593_v0 = vcombine.low %v1296_v59, %v1300_v60  ;;  %v1274_v59 = vld [vmem:[#allocation7 + $0x150] sm:$0xff] }
  0xd5   :  { %2099 = vmatprep.subr.bf16.mxu1 %v2532_v63  ;;  %v1301_v63 = vld [vmem:[#allocation7 + $0x228] sm:$0xff] }
  0xd6   :  { %v2595_v1 = vcombine.low %v1297_v61, %v1301_v63  ;;  %v2596_v2 = vcombine.high %v1297_v61, %v1301_v63  ;;  %v1275_v63 = vld [vmem:[#allocation7 + $0x158] sm:$0xff] }
  0xd7   :  { %2057 = vmatpush1.bf16.msra.mxu0 %v2529_v4  ;;  %v3115_v4 = vld [vmem:[#allocation7 + $0x1f0] sm:$0xff] }
  0xd8   :  { %2100 = vmatpush1.bf16.msra.mxu1 %v2531_v5  ;;  %2058 = vmatprep.subr.bf16.mxu0 %v2650_v6  ;;  %v3117_v5 = vld [vmem:[#allocation7 + $0x1d8] sm:$0xff]  ;;  %v2590_v6 = vcombine.high %v3113_v3, %v3115_v4  ;;  %v2589_v8 = vcombine.low %v3113_v3, %v3115_v4 }
  0xd9   :  { %2101 = vmatprep.subr.bf16.mxu1 %v2652_v7  ;;  %v3121_v7 = vld [vmem:[#allocation7 + $0x1f8] sm:$0xff] }
  0xda   :  { %v2591_v9 = vcombine.low %v3117_v5, %v3121_v7  ;;  %v2592_v10 = vcombine.high %v3117_v5, %v3121_v7  ;;  %v1266_v5 = vld [vmem:[#allocation7 + $0x110] sm:$0xff]  ;;  %v1267_v7 = vld [vmem:[#allocation7 + $0x118] sm:$0xff] }
  0xdb   :  { %2059 = vmatpush2.bf16.msra.mxu0 %v2649_v12 }
  0xdc   :  { %2102 = vmatpush2.bf16.msra.mxu1 %v2651_v13  ;;  %2060 = vmatprep.subr.bf16.mxu0 %v2642_v14  ;;  %v410_v13 = vsub.s32 1, %v3060_v48  ;;  %v402_v14 = vld [vmem:[%s3181_s2] sm:$0x3] }
  0xdd   :  { %2103 = vmatprep.subr.bf16.mxu1 %v2644_v15  ;;  %v406_v15 = vsub.s32 0, %v3060_v48 }
  0xde   :  { %v411_v18 = vrot.slane %v402_v14, %v410_v13 }
  0xdf   :  { %2061 = vmatpush2.bf16.msra.mxu0 %v2641_v20  ;;  %v407_v19 = vrot.slane %v402_v14, %v406_v15  ;;  %v1258_v14 = vld [vmem:[#allocation7 + $0xd0] sm:$0xff] }
  0xe0   :  { %2104 = vmatpush2.bf16.msra.mxu1 %v2643_v21  ;;  %2062 = vmatprep.subr.bf16.mxu0 %v2634_v22 }
  0xe1   :  { %2105 = vmatprep.subr.bf16.mxu1 %v2636_v23 }
  0xe3   :  { %2063 = vmatpush2.bf16.msra.mxu0 %v2633_v28 }
  0xe4   :  { %2106 = vmatpush2.bf16.msra.mxu1 %v2635_v29  ;;  %2064 = vmatprep.subr.bf16.mxu0 %v2626_v30 }
  0xe5   :  { %2107 = vmatprep.subr.bf16.mxu1 %v2628_v31 }
  0xe7   :  { %2065 = vmatpush2.bf16.msra.mxu0 %v2625_v55 }
  0xe8   :  { %2108 = vmatpush2.bf16.msra.mxu1 %v2627_v36  ;;  %2066 = vmatprep.subr.bf16.mxu0 %v2618_v37 }
  0xe9   :  { %2109 = vmatprep.subr.bf16.mxu1 %v2620_v38 }
  0xeb   :  { %2067 = vmatpush2.bf16.msra.mxu0 %v2617_v39 }
  0xec   :  { %2110 = vmatpush2.bf16.msra.mxu1 %v2619_v40  ;;  %2068 = vmatprep.subr.bf16.mxu0 %v2610_v44 }
  0xed   :  { %2111 = vmatprep.subr.bf16.mxu1 %v2612_v49 }
  0xef   :  { %2069 = vmatpush2.bf16.msra.mxu0 %v2609_v46 }
  0xf0   :  { %2112 = vmatpush2.bf16.msra.mxu1 %v2611_v47  ;;  %2070 = vmatprep.subr.bf16.mxu0 %v2602_v53  ;;  %v1286_v53 = vld [vmem:[#allocation7 + $0x1b0] sm:$0xff] }
  0xf1   :  { %2113 = vmatprep.subr.bf16.mxu1 %v2604_v58  ;;  %v2582_v60 = vcombine.high %v1282_v51, %v1286_v53 }
  0xf3   :  { %2071 = vmatpush2.bf16.msra.mxu0 %v2601_v56  ;;  %v1287_v56 = vld [vmem:[#allocation7 + $0x1b8] sm:$0xff] }
  0xf4   :  { %2114 = vmatpush2.bf16.msra.mxu1 %v2603_v57  ;;  %2072 = vmatprep.subr.bf16.mxu0 %v2594_v62  ;;  %v2584_v61 = vcombine.high %v1283_v54, %v1287_v56  ;;  %v1278_v62 = vld [vmem:[#allocation7 + $0x170] sm:$0xff] }
  0xf5   :  { %2115 = vmatprep.subr.bf16.mxu1 %v2596_v2  ;;  %v2583_v2 = vcombine.low %v1283_v54, %v1287_v56  ;;  %v2574_v3 = vcombine.high %v1274_v59, %v1278_v62  ;;  %v1346_v56 = vld [vmem:[#allocation7 + $0x390] sm:$0xff] }
  0xf7   :  { %2073 = vmatpush2.bf16.msra.mxu0 %v2593_v0  ;;  %v1279_v0 = vld [vmem:[#allocation7 + $0x178] sm:$0xff] }
  0xf8   :  { %2116 = vmatpush2.bf16.msra.mxu1 %v2595_v1  ;;  %2128 = vmatprep.subr.bf16.mxu0 %v2590_v6  ;;  %v2581_v1 = vcombine.low %v1282_v51, %v1286_v53  ;;  %v2576_v4 = vcombine.high %v1275_v63, %v1279_v0  ;;  %v1270_v6 = vld [vmem:[#allocation7 + $0x130] sm:$0xff] }
  0xf9   :  { %2171 = vmatprep.subr.bf16.mxu1 %v2592_v10  ;;  %v1271_v10 = vld [vmem:[#allocation7 + $0x138] sm:$0xff] }
 0x13a   :  { %v1088_v11 = vpop.f32.mrf.mxu0 }
 0x13b   :  { %v1131_v12 = vpop.f32.mrf.mxu1  ;;  %v1089_v23 = vadd.f32 %v1088_v11, %v407_v19  ;;  %v2573_v11 = vcombine.low %v1274_v59, %v1278_v62  ;;  %v1347_v59 = vld [vmem:[#allocation7 + $0x398] sm:$0xff] }
 0x13c   :  { %v1090_v16 = vpop.f32.mrf.mxu0 }
 0x13d   :  { %v1133_v17 = vpop.f32.mrf.mxu1  ;;  %v1091_v22 = vadd.f32 %v1090_v16, %v411_v18  ;;  %v1132_v31 = vadd.f32 %v1131_v12, %v1089_v23  ;;  %v2575_v12 = vcombine.low %v1275_v63, %v1279_v0  ;;  %v1262_v16 = vld [vmem:[#allocation7 + $0xf0] sm:$0xff] }
 0x13e   :  { %v1092_v20 = vpop.f32.mrf.mxu0  ;;  %v1250_v23 = vld [vmem:[#allocation7 + $0x90] sm:$0xff] }
 0x13f   :  { %v1135_v21 = vpop.f32.mrf.mxu1  ;;  %v1093_v26 = vadd.f32 %v1092_v20, %v407_v19  ;;  %v1134_v29 = vadd.f32 %v1133_v17, %v1091_v22  ;;  %v1259_v17 = vld [vmem:[#allocation7 + $0xd8] sm:$0xff]  ;;  %v2565_v19 = vcombine.low %v1266_v5, %v1270_v6  ;;  %v2567_v20 = vcombine.low %v1267_v7, %v1271_v10 }
 0x140   :  { %v1094_v24 = vpop.f32.mrf.mxu0 }
 0x141   :  { %v1137_v25 = vpop.f32.mrf.mxu1  ;;  %v1095_v30 = vadd.f32 %v1094_v24, %v411_v18  ;;  %v1136_v34 = vadd.f32 %v1135_v21, %v1093_v26  ;;  %v1263_v18 = vld [vmem:[#allocation7 + $0xf8] sm:$0xff]  ;;  %v2558_v21 = vcombine.high %v1258_v14, %v1262_v16  ;;  %v1254_v24 = vld [vmem:[#allocation7 + $0xb0] sm:$0xff] }
 0x142   :  { %v2560_v22 = vcombine.high %v1259_v17, %v1263_v18  ;;  %v1255_v26 = vld [vmem:[#allocation7 + $0xb8] sm:$0xff] }
 0x143   :  { %v1138_v38 = vadd.f32 %v1137_v25, %v1095_v30  ;;  %v1251_v25 = vld [vmem:[#allocation7 + $0x98] sm:$0xff] }
 0x144   :  { %v2552_v30 = vcombine.high %v1251_v25, %v1255_v26 }
 0x17a   :  { %v1174_v27 = vpop.f32.mrf.mxu0 }
 0x17b   :  { %v1217_v28 = vpop.f32.mrf.mxu1  ;;  %v1175_v55 = vadd.f32 %v1174_v27, %v1132_v31  ;;  %v2557_v27 = vcombine.low %v1258_v14, %v1262_v16  ;;  %v1242_v31 = vld [vmem:[#allocation7 + $0x50] sm:$0xff] }
 0x17c   :  { %v1176_v32 = vpop.f32.mrf.mxu0 }
 0x17d   :  { %v1219_v33 = vpop.f32.mrf.mxu1  ;;  %v1177_v35 = vadd.f32 %v1176_v32, %v1134_v29  ;;  %v1218_v44 = vadd.f32 %v1217_v28, %v1175_v55  ;;  %v2559_v28 = vcombine.low %v1259_v17, %v1263_v18  ;;  %v2550_v29 = vcombine.high %v1250_v23, %v1254_v24  ;;  %v1246_v32 = vld [vmem:[#allocation7 + $0x70] sm:$0xff] }
 0x17e   :  { %v1178_v36 = vpop.f32.mrf.mxu0  ;;  %v2551_v55 = vcombine.low %v1251_v25, %v1255_v26 }
 0x17f   :  { %v1221_v37 = vpop.f32.mrf.mxu1  ;;  %v1179_v39 = vadd.f32 %v1178_v36, %v1136_v34  ;;  %v1220_v41 = vadd.f32 %v1219_v33, %v1177_v35  ;;  %v1226_v52 = vmax.f32 %v1218_v44, 0.0  ;;  %v1243_v33 = vld [vmem:[#allocation7 + $0x58] sm:$0xff]  ;;  %v2549_v35 = vcombine.low %v1250_v23, %v1254_v24 }
 0x180   :  { %v1180_v40 = vpop.f32.mrf.mxu0  ;;  %v1247_v34 = vld [vmem:[#allocation7 + $0x78] sm:$0xff]  ;;  %v2542_v36 = vcombine.high %v1242_v31, %v1246_v32 }
 0x181   :  { %v1222_v42 = vadd.f32 %v1221_v37, %v1179_v39  ;;  %v1181_v43 = vadd.f32 %v1180_v40, %v1138_v38  ;;  %v1223_v45 = vpop.f32.mrf.mxu1  ;;  %v1227_v49 = vmax.f32 %v1220_v41, 0.0  ;;  %v2544_v37 = vcombine.high %v1243_v33, %v1247_v34  ;;  %v1234_v38 = vld [vmem:[#allocation7 + $0x10] sm:$0xff]  ;;  %v1235_v40 = vld [vmem:[#allocation7 + $0x18] sm:$0xff] }
 0x182   :  { %v1238_v39 = vld [vmem:[#allocation7 + $0x30] sm:$0xff]  ;;  %v1239_v41 = vld [vmem:[#allocation7 + $0x38] sm:$0xff] }
 0x183   :  { %v1224_v46 = vadd.f32 %v1223_v45, %v1181_v43  ;;  %v1228_v47 = vmax.f32 %v1222_v42, 0.0  ;;  %v2541_v42 = vcombine.low %v1242_v31, %v1246_v32  ;;  %v2543_v43 = vcombine.low %v1243_v33, %v1247_v34 }
 0x184   :  { %v2534_v44 = vcombine.high %v1234_v38, %v1238_v39  ;;  %v2536_v45 = vcombine.high %v1235_v40, %v1239_v41  ;;  %v2533_v51 = vcombine.low %v1234_v38, %v1238_v39 }
 0x185   :  { %v1229_v50 = vmax.f32 %v1224_v46, 0.0  ;;  %v3138_v58 = vpack.c.bf16 %v1228_v47, %v1226_v52  ;;  %v1354_v46 = vld [vmem:[#allocation7 + $0x3d0] sm:$0xff]  ;;  %v2535_v52 = vcombine.low %v1235_v40, %v1239_v41 }
 0x186   :  { %v1358_v47 = vld [vmem:[#allocation7 + $0x3f0] sm:$0xff] }
 0x187   :  { %v1231_v57 = vpack.c.bf16 %v1229_v50, %v1227_v49  ;;  %v1355_v49 = vld [vmem:[#allocation7 + $0x3d8] sm:$0xff]  ;;  %v2654_v53 = vcombine.high %v1354_v46, %v1358_v47 }
 0x188   :  { %v1359_v50 = vld [vmem:[#allocation7 + $0x3f8] sm:$0xff] }
 0x189   :  { %2074 = vmatprep.mubr.bf16.mxu0 %v1231_v57  ;;  %2117 = vmatprep.mubr.bf16.mxu1 %v1231_v57  ;;  %v2656_v54 = vcombine.high %v1355_v49, %v1359_v50  ;;  %v2655_v62 = vcombine.low %v1355_v49, %v1359_v50 }
 0x18a   :  { %2075 = vmatmul.mubr.bf16.vlgmr.msra.gmra.mxu0 %v3138_v58  ;;  %2118 = vmatmul.mubr.bf16.vlgmr.msra.gmra.mxu1 %v3138_v58 }
 0x18b   :  { %2129 = vmatpush1.bf16.msra.mxu0 %v2589_v8  ;;  %2172 = vmatpush1.bf16.msra.mxu1 %v2591_v9  ;;  %v2566_v8 = vcombine.high %v1266_v5, %v1270_v6  ;;  %v2568_v9 = vcombine.high %v1267_v7, %v1271_v10 }
 0x18c   :  { %2160 = vmatprep.mubr.bf16.mxu0 %v1231_v57  ;;  %2203 = vmatprep.mubr.bf16.mxu1 %v1231_v57  ;;  %v1350_v57 = vld [vmem:[#allocation7 + $0x3b0] sm:$0xff] }
 0x18d   :  { %2130 = vmatprep.subr.bf16.mxu0 %v2582_v60  ;;  %2173 = vmatprep.subr.bf16.mxu1 %v2584_v61  ;;  %v1351_v60 = vld [vmem:[#allocation7 + $0x3b8] sm:$0xff]  ;;  %v2653_v61 = vcombine.low %v1354_v46, %v1358_v47  ;;  %v2646_v63 = vcombine.high %v1346_v56, %v1350_v57  ;;  %v2645_v5 = vcombine.low %v1346_v56, %v1350_v57  ;;  %v1376_v56 = vsub.s32 3, %v3060_v48 }
 0x18e   :  { %v2648_v0 = vcombine.high %v1347_v59, %v1351_v60  ;;  %v2647_v6 = vcombine.low %v1347_v59, %v1351_v60  ;;  %v1372_v57 = vsub.s32 2, %v3060_v48  ;;  %v1360_v59 = vld [vmem:[#allocation8] sm:$0xff] }
 0x18f   :  { %2131 = vmatpush1.bf16.msra.mxu0 %v2581_v1  ;;  %2174 = vmatpush1.bf16.msra.mxu1 %v2583_v2  ;;  %v1338_v1 = vld [vmem:[#allocation7 + $0x350] sm:$0xff] }
 0x190   :  { %2132 = vmatprep.subr.bf16.mxu0 %v2574_v3  ;;  %2175 = vmatprep.subr.bf16.mxu1 %v2576_v4  ;;  %v1342_v2 = vld [vmem:[#allocation7 + $0x370] sm:$0xff]  ;;  %v1339_v3 = vld [vmem:[#allocation7 + $0x358] sm:$0xff] }
 0x191   :  { %v1343_v4 = vld [vmem:[#allocation7 + $0x378] sm:$0xff]  ;;  %v2638_v7 = vcombine.high %v1338_v1, %v1342_v2  ;;  %v2637_v14 = vcombine.low %v1338_v1, %v1342_v2  ;;  %v1377_v1 = vrot.slane %v1360_v59, %v1376_v56  ;;  %v1365_v2 = vrot.slane %v1360_v59, %v406_v15 }
 0x192   :  { %v2640_v10 = vcombine.high %v1339_v3, %v1343_v4  ;;  %v2639_v16 = vcombine.low %v1339_v3, %v1343_v4  ;;  %v1373_v3 = vrot.slane %v1360_v59, %v1372_v57 }
 0x193   :  { %2133 = vmatpush1.bf16.msra.mxu0 %v2573_v11  ;;  %2176 = vmatpush1.bf16.msra.mxu1 %v2575_v12  ;;  %v1330_v11 = vld [vmem:[#allocation7 + $0x310] sm:$0xff] }
 0x194   :  { %2134 = vmatprep.subr.bf16.mxu0 %v2566_v8  ;;  %2177 = vmatprep.subr.bf16.mxu1 %v2568_v9  ;;  %v1334_v12 = vld [vmem:[#allocation7 + $0x330] sm:$0xff]  ;;  %v1331_v8 = vld [vmem:[#allocation7 + $0x318] sm:$0xff] }
 0x195   :  { %v1335_v9 = vld [vmem:[#allocation7 + $0x338] sm:$0xff]  ;;  %v2630_v17 = vcombine.high %v1330_v11, %v1334_v12  ;;  %v2629_v23 = vcombine.low %v1330_v11, %v1334_v12  ;;  %v1388_v11 = vsub.s32 6, %v3060_v48  ;;  %v1384_v12 = vsub.s32 5, %v3060_v48 }
 0x196   :  { %v2632_v18 = vcombine.high %v1331_v8, %v1335_v9  ;;  %v2631_v24 = vcombine.low %v1331_v8, %v1335_v9 }
 0x197   :  { %2135 = vmatpush1.bf16.msra.mxu0 %v2565_v19  ;;  %2178 = vmatpush1.bf16.msra.mxu1 %v2567_v20  ;;  %v1322_v19 = vld [vmem:[#allocation7 + $0x2d0] sm:$0xff] }
 0x198   :  { %2136 = vmatprep.subr.bf16.mxu0 %v2558_v21  ;;  %2179 = vmatprep.subr.bf16.mxu1 %v2560_v22  ;;  %v1326_v20 = vld [vmem:[#allocation7 + $0x2f0] sm:$0xff]  ;;  %v1323_v21 = vld [vmem:[#allocation7 + $0x2d8] sm:$0xff] }
 0x199   :  { %v1327_v22 = vld [vmem:[#allocation7 + $0x2f8] sm:$0xff]  ;;  %v2622_v25 = vcombine.high %v1322_v19, %v1326_v20  ;;  %v2621_v31 = vcombine.low %v1322_v19, %v1326_v20  ;;  %v1389_v20 = vrot.slane %v1360_v59, %v1388_v11 }
 0x19a   :  { %v2624_v26 = vcombine.high %v1323_v21, %v1327_v22  ;;  %v2623_v32 = vcombine.low %v1323_v21, %v1327_v22  ;;  %v1385_v21 = vrot.slane %v1360_v59, %v1384_v12 }
 0x19b   :  { %2137 = vmatpush1.bf16.msra.mxu0 %v2557_v27  ;;  %2180 = vmatpush1.bf16.msra.mxu1 %v2559_v28  ;;  %v1314_v27 = vld [vmem:[#allocation7 + $0x290] sm:$0xff] }
 0x19c   :  { %2138 = vmatprep.subr.bf16.mxu0 %v2550_v29  ;;  %2181 = vmatprep.subr.bf16.mxu1 %v2552_v30  ;;  %v1318_v28 = vld [vmem:[#allocation7 + $0x2b0] sm:$0xff]  ;;  %v1315_v29 = vld [vmem:[#allocation7 + $0x298] sm:$0xff] }
 0x19d   :  { %v1319_v30 = vld [vmem:[#allocation7 + $0x2b8] sm:$0xff]  ;;  %v2614_v33 = vcombine.high %v1314_v27, %v1318_v28  ;;  %v2613_v38 = vcombine.low %v1314_v27, %v1318_v28 }
 0x19e   :  { %v2616_v34 = vcombine.high %v1315_v29, %v1319_v30  ;;  %v2615_v39 = vcombine.low %v1315_v29, %v1319_v30 }
 0x19f   :  { %2139 = vmatpush1.bf16.msra.mxu0 %v2549_v35  ;;  %2182 = vmatpush1.bf16.msra.mxu1 %v2551_v55  ;;  %v1306_v35 = vld [vmem:[#allocation7 + $0x250] sm:$0xff] }
 0x1a0   :  { %2140 = vmatprep.subr.bf16.mxu0 %v2542_v36  ;;  %2183 = vmatprep.subr.bf16.mxu1 %v2544_v37  ;;  %v1310_v55 = vld [vmem:[#allocation7 + $0x270] sm:$0xff]  ;;  %v1307_v36 = vld [vmem:[#allocation7 + $0x258] sm:$0xff] }
 0x1a1   :  { %v1311_v37 = vld [vmem:[#allocation7 + $0x278] sm:$0xff]  ;;  %v2606_v40 = vcombine.high %v1306_v35, %v1310_v55  ;;  %v2605_v46 = vcombine.low %v1306_v35, %v1310_v55 }
 0x1a2   :  { %v2608_v41 = vcombine.high %v1307_v36, %v1311_v37  ;;  %v2607_v47 = vcombine.low %v1307_v36, %v1311_v37 }
 0x1a3   :  { %2141 = vmatpush1.bf16.msra.mxu0 %v2541_v42  ;;  %2184 = vmatpush1.bf16.msra.mxu1 %v2543_v43  ;;  %v1298_v42 = vld [vmem:[#allocation7 + $0x210] sm:$0xff] }
 0x1a4   :  { %2142 = vmatprep.subr.bf16.mxu0 %v2534_v44  ;;  %2185 = vmatprep.subr.bf16.mxu1 %v2536_v45  ;;  %v1302_v43 = vld [vmem:[#allocation7 + $0x230] sm:$0xff]  ;;  %v1299_v44 = vld [vmem:[#allocation7 + $0x218] sm:$0xff] }
 0x1a5   :  { %v1303_v45 = vld [vmem:[#allocation7 + $0x238] sm:$0xff]  ;;  %v2598_v49 = vcombine.high %v1298_v42, %v1302_v43 }
 0x1a6   :  { %v2600_v50 = vcombine.high %v1299_v44, %v1303_v45 }
 0x1a7   :  { %2143 = vmatpush1.bf16.msra.mxu0 %v2533_v51  ;;  %2186 = vmatpush1.bf16.msra.mxu1 %v2535_v52  ;;  %v2597_v51 = vcombine.low %v1298_v42, %v1302_v43  ;;  %v2599_v52 = vcombine.low %v1299_v44, %v1303_v45 }
 0x1a8   :  { %2144 = vmatprep.subr.bf16.mxu0 %v2654_v53  ;;  %2187 = vmatprep.subr.bf16.mxu1 %v2656_v54 }
 0x1ab   :  { %2145 = vmatpush2.bf16.msra.mxu0 %v2653_v61  ;;  %2188 = vmatpush2.bf16.msra.mxu1 %v2655_v62  ;;  %v1369_v62 = vrot.slane %v1360_v59, %v410_v13  ;;  %v1392_v13 = vsub.s32 7, %v3060_v48 }
 0x1ac   :  { %2146 = vmatprep.subr.bf16.mxu0 %v2646_v63  ;;  %2189 = vmatprep.subr.bf16.mxu1 %v2648_v0  ;;  %v3013_v63 = vmov 1966171168  }
 0x1ad   :  { %v2239_v0 = vunpack.c.l.s4 %v3013_v63  ;;  %v1393_v22 = vrot.slane %v1360_v59, %v1392_v13 }
 0x1af   :  { %2147 = vmatpush2.bf16.msra.mxu0 %v2645_v5  ;;  %2190 = vmatpush2.bf16.msra.mxu1 %v2647_v6  ;;  %v2240_v6 = vunpack.c.0.s8 %v2239_v0 }
 0x1b0   :  { %2148 = vmatprep.subr.bf16.mxu0 %v2638_v7  ;;  %2191 = vmatprep.subr.bf16.mxu1 %v2640_v10  ;;  %v1380_v10 = vsub.s32 4, %v3060_v48 }
 0x1b1   :  { %v3155_v15 = vsub.s32 %v2240_v6, %v3060_v48 }
 0x1b2   :  { %v1381_v19 = vrot.slane %v1360_v59, %v1380_v10 }
 0x1b3   :  { %2149 = vmatpush2.bf16.msra.mxu0 %v2637_v14  ;;  %2192 = vmatpush2.bf16.msra.mxu1 %v2639_v16 }
 0x1b4   :  { %2150 = vmatprep.subr.bf16.mxu0 %v2630_v17  ;;  %2193 = vmatprep.subr.bf16.mxu1 %v2632_v18 }
 0x1b7   :  { %2151 = vmatpush2.bf16.msra.mxu0 %v2629_v23  ;;  %2194 = vmatpush2.bf16.msra.mxu1 %v2631_v24 }
 0x1b8   :  { %2152 = vmatprep.subr.bf16.mxu0 %v2622_v25  ;;  %2195 = vmatprep.subr.bf16.mxu1 %v2624_v26 }
 0x1bb   :  { %2153 = vmatpush2.bf16.msra.mxu0 %v2621_v31  ;;  %2196 = vmatpush2.bf16.msra.mxu1 %v2623_v32 }
 0x1bc   :  { %2154 = vmatprep.subr.bf16.mxu0 %v2614_v33  ;;  %2197 = vmatprep.subr.bf16.mxu1 %v2616_v34 }
 0x1bf   :  { %2155 = vmatpush2.bf16.msra.mxu0 %v2613_v38  ;;  %2198 = vmatpush2.bf16.msra.mxu1 %v2615_v39 }
 0x1c0   :  { %2156 = vmatprep.subr.bf16.mxu0 %v2606_v40  ;;  %2199 = vmatprep.subr.bf16.mxu1 %v2608_v41 }
 0x1c3   :  { %2157 = vmatpush2.bf16.msra.mxu0 %v2605_v46  ;;  %2200 = vmatpush2.bf16.msra.mxu1 %v2607_v47 }
 0x1c4   :  { %2158 = vmatprep.subr.bf16.mxu0 %v2598_v49  ;;  %2201 = vmatprep.subr.bf16.mxu1 %v2600_v50 }
 0x1c7   :  { %2159 = vmatpush2.bf16.msra.mxu0 %v2597_v51  ;;  %2202 = vmatpush2.bf16.msra.mxu1 %v2599_v52 }
 0x1ca   :  { %2161 = vmatmul.mubr.bf16.vlgmr.msra.gmra.mxu0 %v3138_v58  ;;  %2204 = vmatmul.mubr.bf16.vlgmr.msra.gmra.mxu1 %v3138_v58 }
 0x24a   :  { %v2076_v53 = vpop.f32.mrf.mxu0  ;;  %v2119_v54 = vpop.f32.mrf.mxu1 }
 0x24b   :  { %v2077_v8 = vadd.f32 %v2076_v53, %v1365_v2  ;;  %v2120_v9 = vadd.f32 %v2119_v54, %v1373_v3 }
 0x24c   :  { %v2078_v60 = vpop.f32.mrf.mxu0  ;;  %v2121_v61 = vpop.f32.mrf.mxu1 }
 0x24d   :  { %v2079_v5 = vadd.f32 %v2078_v60, %v1369_v62  ;;  %v2122_v7 = vadd.f32 %v2121_v61, %v1377_v1 }
 0x24e   :  { %v2080_v58 = vpop.f32.mrf.mxu0  ;;  %v2123_v4 = vpop.f32.mrf.mxu1 }
 0x24f   :  { %v2657_v17 = vpack.c.bf16 %v2079_v5, %v2077_v8  ;;  %v2659_v18 = vpack.c.bf16 %v2122_v7, %v2120_v9  ;;  %v2081_v29 = vadd.f32 %v2080_v58, %v1365_v2  ;;  %v2124_v30 = vadd.f32 %v2123_v4, %v1373_v3 }
 0x250   :  { %v2082_v14 = vpop.f32.mrf.mxu0  ;;  %v2125_v16 = vpop.f32.mrf.mxu1 }
 0x251   :  { %v2083_v23 = vadd.f32 %v2082_v14, %v1369_v62  ;;  %v2126_v24 = vadd.f32 %v2125_v16, %v1377_v1  ;;  %v2244_v27 = vrot.slane %v2657_v17, %v3155_v15  ;;  %v2258_v28 = vrot.slane %v2659_v18, %v3155_v15 }
 0x253   :  { %v2658_v55 = vpack.c.bf16 %v2083_v23, %v2081_v29  ;;  %v2660_v36 = vpack.c.bf16 %v2126_v24, %v2124_v30  ;;  %v2294_v41 = vcombine.low %v2244_v27, %v2258_v28  ;;  %v2295_v42 = vcombine.high %v2244_v27, %v2258_v28 }
 0x255   :  { %v2251_v52 = vrot.slane %v2658_v55, %v3155_v15  ;;  %v2265_v53 = vrot.slane %v2660_v36, %v3155_v15  ;;  %v2308_v60 = vrot.slane %v2294_v41, %v3155_v15  ;;  %v2322_v61 = vrot.slane %v2295_v42, %v3155_v15 }
 0x257   :  { %v2296_v2 = vcombine.low %v2251_v52, %v2265_v53  ;;  %v2297_v3 = vcombine.high %v2251_v52, %v2265_v53 }
 0x259   :  { %v2315_v11 = vrot.slane %v2296_v2, %v3155_v15  ;;  %v2329_v12 = vrot.slane %v2297_v3, %v3155_v15 }
 0x28a   :  { %v2162_v25 = vpop.f32.mrf.mxu0  ;;  %v2205_v26 = vpop.f32.mrf.mxu1 }
 0x28b   :  { %v2163_v33 = vadd.f32 %v2162_v25, %v1381_v19  ;;  %v2206_v48 = vadd.f32 %v2205_v26, %v1389_v20 }
 0x28c   :  { %v2164_v31 = vpop.f32.mrf.mxu0  ;;  %v2207_v32 = vpop.f32.mrf.mxu1 }
 0x28d   :  { %v2165_v34 = vadd.f32 %v2164_v31, %v1385_v21  ;;  %v2208_v35 = vadd.f32 %v2207_v32, %v1393_v22 }
 0x28e   :  { %v2166_v37 = vpop.f32.mrf.mxu0  ;;  %v2209_v38 = vpop.f32.mrf.mxu1 }
 0x28f   :  { %v2661_v39 = vpack.c.bf16 %v2165_v34, %v2163_v33  ;;  %v2663_v40 = vpack.c.bf16 %v2208_v35, %v2206_v48  ;;  %v2167_v43 = vadd.f32 %v2166_v37, %v1381_v19  ;;  %v2210_v44 = vadd.f32 %v2209_v38, %v1389_v20 }
 0x290   :  { %v2168_v45 = vpop.f32.mrf.mxu0  ;;  %v2211_v46 = vpop.f32.mrf.mxu1 }
 0x291   :  { %v2272_v47 = vrot.slane %v2661_v39, %v3155_v15  ;;  %v2286_v49 = vrot.slane %v2663_v40, %v3155_v15  ;;  %v2169_v50 = vadd.f32 %v2168_v45, %v1385_v21  ;;  %v2212_v51 = vadd.f32 %v2211_v46, %v1393_v22 }
 0x293   :  { %v2298_v54 = vcombine.low %v2272_v47, %v2286_v49  ;;  %v2299_v56 = vcombine.high %v2272_v47, %v2286_v49  ;;  %v2662_v57 = vpack.c.bf16 %v2169_v50, %v2167_v43  ;;  %v2664_v59 = vpack.c.bf16 %v2212_v51, %v2210_v44 }
 0x295   :  { %v2336_v62 = vrot.slane %v2298_v54, %v3155_v15  ;;  %v2350_v63 = vrot.slane %v2299_v56, %v3155_v15  ;;  %v2279_v0 = vrot.slane %v2662_v57, %v3155_v15  ;;  %v2293_v1 = vrot.slane %v2664_v59, %v3155_v15 }
 0x297   :  { %v2358_v58 = vcombine.low %v2308_v60, %v2336_v62  ;;  %v2359_v4 = vcombine.high %v2308_v60, %v2336_v62  ;;  %v2362_v5 = vcombine.low %v2322_v61, %v2350_v63  ;;  %v2363_v6 = vcombine.high %v2322_v61, %v2350_v63 }
 0x298   :  { %v2300_v7 = vcombine.low %v2279_v0, %v2293_v1  ;;  %v2301_v10 = vcombine.high %v2279_v0, %v2293_v1 }
 0x299   :  { %2374 = vst [vmem:[#allocation10] sm:$0xff] %v2358_v58  ;;  %2375 = vst [vmem:[#allocation10 + $0x8] sm:$0xff] %v2362_v5 }
 0x29a   :  { %2376 = vst [vmem:[#allocation10 + $0x10] sm:$0xff] %v2359_v4  ;;  %2377 = vst [vmem:[#allocation10 + $0x18] sm:$0xff] %v2363_v6  ;;  %v2343_v13 = vrot.slane %v2300_v7, %v3155_v15  ;;  %v2357_v8 = vrot.slane %v2301_v10, %v3155_v15 }
 0x29c   :  { %v2360_v9 = vcombine.low %v2315_v11, %v2343_v13  ;;  %v2361_v14 = vcombine.high %v2315_v11, %v2343_v13  ;;  %v2364_v16 = vcombine.low %v2329_v12, %v2357_v8  ;;  %v2365_v17 = vcombine.high %v2329_v12, %v2357_v8 }
 0x29e   :  { %2378 = vst [vmem:[#allocation10 + $0x20] sm:$0xff] %v2360_v9  ;;  %2379 = vst [vmem:[#allocation10 + $0x28] sm:$0xff] %v2364_v16 }
 0x29f   :  { %2380 = vst [vmem:[#allocation10 + $0x30] sm:$0xff] %v2361_v14  ;;  %2381 = vst [vmem:[#allocation10 + $0x38] sm:$0xff] %v2365_v17 }
 0x2a0   :  { %2386 = vsyncadd [#allocation4], 896  ;;  %s3014_s2 = smov [#allocation10]  }
 0x2a1   :  { %s2387_s18 = sshll.u32 %s3014_s2, 4  ;;  %s2388_s18 = int_to_ptr.vmem [resolvable:$true] %s2387_s18 }
 0x2a2   :  { %s2974_s19 = scalar_lea.vmem %s2388_s18, 128  ;;  %s2978_s20 = scalar_lea.vmem %s2388_s18, 1024 }
 0x2a3   :  { %p2975_p6 = scmp.ne.s32.totalorder %s2388_s18, %s2974_s19  ;;  %p2979_p7 = scmp.lt.s32.totalorder %s2388_s18, %s2388_s18 }
 0x2a4   :  { %p2980_p8 = scmp.lt.s32.totalorder %s2978_s20, %s2974_s19 }
 0x2a6   :  { %p2981_p9 = por %p2980_p8, %p2979_p7 }
 0x2a8   :  { %p2982_p10 = pnand %p2981_p9, %p2975_p6 }
 0x2aa   :  { %2985 = shalt.err (!%p2982_p10)
}
 0x2ab   :  { %2393 = dma.vmem_to_hbm [thread:$0]  %s2388_s18, 128, %s3184_s5, [#allocation4], %s3003_s21, %s3003_s21, %s3004_s22  }
 0x2ac   :  { %3000 = dma.done.wait [#allocation4], 1024  }
 0x2ad   :  { %3001 = vsyncadd [#allocation4], 4294966272 }
 0x2ae   :  { %2397 = vsyncpa [#allocation3], 1 }
 0x2af   :  { %2398 = vsyncpa [#allocation6], 1 }
 0x2b0   :  { %2399 = vsyncpa [#allocation9], 1 }
 0x2b1   :  { %2400 = vsyncpa [#allocation4], 1 }

</bundles_post_ra>
